<compile_context>
chip_gen: v7x
topology: tpu7x:2x2x1
jax: 0.10.0
libtpu: 0.0.40
codegen_flags: <defaults>
</compile_context>

<pallas_src>
import functools
import math

import jax
import jax.numpy as jnp
from jax import lax
from jax.experimental import pallas as pl
from jax.experimental.pallas import tpu as pltpu


# ----------------------------- embed kernel -----------------------------
# in_proj (obs part + action part) + bias + reward token + positional encoding, one launch.

def _embed_kernel(xobs_ref, xact_ref, wobs_ref, wact_ref, b_ref, tok_ref, pos_ref, o_ref,
                  *, l_obs):
    n = xobs_ref.shape[0]
    # per-sample action contribution (shared across obs tokens) + bias: [N, D]
    act_proj = jnp.dot(xact_ref[...], wact_ref[...],
                       preferred_element_type=jnp.float32) + b_ref[...]
    rtok = tok_ref[...] + pos_ref[l_obs:, :]          # [1, D] reward token + its pos row
    pos_obs = pos_ref[:l_obs, :]                      # [l_obs, D]
    for b in range(n):                                # tiny static batch loop (unrolled)
        obs_proj = jnp.dot(xobs_ref[b], wobs_ref[...],
                           preferred_element_type=jnp.float32)          # [l_obs, D]
        o_ref[b, :l_obs, :] = obs_proj + act_proj[b:b + 1, :] + pos_obs
        o_ref[b, l_obs:, :] = rtok


def pallas_embed(x_obs, x_act, p):
    N, L_obs, _ = x_obs.shape
    L, D = p["pos_encoding"].shape
    kernel = functools.partial(_embed_kernel, l_obs=L_obs)
    return pl.pallas_call(
        kernel,
        out_shape=jax.ShapeDtypeStruct((N, L, D), jnp.float32),
    )(x_obs, x_act, p["in_w_obs"], p["in_w_act"], p["in_b"],
      p["reward_token"], p["pos_encoding"])


# ----------------------------- fused transformer layer kernel -----------------------------
# One grid step per batch element: qkv proj, sparse attention over all heads, o-proj,
# residual + LN1, FFN, residual + LN2, attention_sum accumulation, eta update.

def _layer_kernel(x_ref, asum_ref, eta_ref,
                  wqkv_ref, bqkv_ref, wo_ref, bo_ref,
                  ln1g_ref, ln1b_ref, w1_ref, b1_ref, w2_ref, b2_ref,
                  ln2g_ref, ln2b_ref,
                  xo_ref, asumo_ref, etao_ref,
                  *, n_heads, threshold):
    x = x_ref[0]                                     # [L, D]
    L, D = x.shape
    dk = D // n_heads
    scale = 1.0 / math.sqrt(dk)

    # fused q/k/v projection: one MXU pass, lane-dense [L, 3D] output
    qkv = jnp.dot(x, wqkv_ref[...], preferred_element_type=jnp.float32) + bqkv_ref[...]
    q, k, v = qkv[:, :D], qkv[:, D:2 * D], qkv[:, 2 * D:]

    probs_sum = jnp.zeros((L, L), jnp.float32)
    mask_sum = jnp.zeros((L, L), jnp.float32)
    wv_parts = []
    for h in range(n_heads):                         # static unrolled head loop
        sl = slice(h * dk, (h + 1) * dk)
        qh, kh, vh = q[:, sl], k[:, sl], v[:, sl]
        # q @ k^T without materializing the transpose (NT matmul on the MXU)
        s = lax.dot_general(qh, kh, (((1,), (1,)), ((), ())),
                            preferred_element_type=jnp.float32) * scale
        s = s - jnp.max(s, axis=-1, keepdims=True)
        e = jnp.exp(s)
        probs = e * pl.reciprocal(jnp.sum(e, axis=-1, keepdims=True), approx=True)
        keep = probs >= threshold                    # ~(probs < threshold)
        wv_parts.append(jnp.dot(jnp.where(keep, probs, 0.0), vh,
                                preferred_element_type=jnp.float32))
        probs_sum = probs_sum + probs
        mask_sum = mask_sum + keep.astype(jnp.float32)
    merged = jnp.concatenate(wv_parts, axis=-1)      # [L, D] lane-dense merge of heads

    attn = jnp.dot(merged, wo_ref[...], preferred_element_type=jnp.float32) + bo_ref[...]

    def layer_norm(y, g, b):
        mu = jnp.mean(y, axis=-1, keepdims=True)
        var = jnp.mean((y - mu) ** 2, axis=-1, keepdims=True)
        return (y - mu) * lax.rsqrt(var + 1e-5) * g + b

    x1 = layer_norm(x + attn, ln1g_ref[...], ln1b_ref[...])
    h1 = jnp.maximum(jnp.dot(x1, w1_ref[...], preferred_element_type=jnp.float32)
                     + b1_ref[...], 0.0)
    ffn = jnp.dot(h1, w2_ref[...], preferred_element_type=jnp.float32) + b2_ref[...]
    x2 = layer_norm(x1 + ffn, ln2g_ref[...], ln2b_ref[...])

    xo_ref[...] = x2[None]
    asumo_ref[...] = (asum_ref[0] + probs_sum)[None]

    # eta bookkeeping: eta += mask_sum @ eta ; eta = (eta != 0)
    eta = eta_ref[0]
    eta_new = eta + jnp.dot(mask_sum, eta, preferred_element_type=jnp.float32)
    etao_ref[...] = jnp.where(eta_new != 0.0, 1.0, 0.0).astype(jnp.float32)[None]


def pallas_layer(x, att_sum, eta, lp, n_heads, threshold):
    N, L, D = x.shape
    F = lp["w1"].shape[1]
    kernel = functools.partial(_layer_kernel, n_heads=n_heads, threshold=threshold)

    def full2d(shape):
        return pl.BlockSpec(shape, lambda b: (0, 0))

    return pl.pallas_call(
        kernel,
        out_shape=(jax.ShapeDtypeStruct((N, L, D), jnp.float32),
                   jax.ShapeDtypeStruct((N, L, L), jnp.float32),
                   jax.ShapeDtypeStruct((N, L, L), jnp.float32)),
        grid=(N,),
        in_specs=[
            pl.BlockSpec((1, L, D), lambda b: (b, 0, 0)),   # x
            pl.BlockSpec((1, L, L), lambda b: (b, 0, 0)),   # attention_sum (running)
            pl.BlockSpec((1, L, L), lambda b: (b, 0, 0)),   # eta (running)
            full2d((D, 3 * D)),   # wqkv
            full2d((1, 3 * D)),   # bqkv
            full2d((D, D)),       # wo
            full2d((1, D)),       # bo
            full2d((1, D)),       # ln1_g
            full2d((1, D)),       # ln1_b
            full2d((D, F)),       # w1
            full2d((1, F)),       # b1
            full2d((F, D)),       # w2
            full2d((1, D)),       # b2
            full2d((1, D)),       # ln2_g
            full2d((1, D)),       # ln2_b
        ],
        out_specs=(
            pl.BlockSpec((1, L, D), lambda b: (b, 0, 0)),
            pl.BlockSpec((1, L, L), lambda b: (b, 0, 0)),
            pl.BlockSpec((1, L, L), lambda b: (b, 0, 0)),
        ),
        compiler_params=pltpu.CompilerParams(dimension_semantics=("parallel",)),
    )(x, att_sum, eta,
      lp["wqkv"], lp["bqkv"], lp["wo"], lp["bo"],
      lp["ln1_g"], lp["ln1_b"], lp["w1"], lp["b1"], lp["w2"], lp["b2"],
      lp["ln2_g"], lp["ln2_b"])


# ----------------------------- fused output heads kernel -----------------------------
# obs head + reward head share one [D, Cout+1] matmul; outputs split inside the kernel.

def _head_kernel(x_ref, w_ref, b_ref, obs_ref, rew_ref, *, l_obs, c_out):
    n = x_ref.shape[0]
    for b in range(n):
        y = jnp.dot(x_ref[b], w_ref[...], preferred_element_type=jnp.float32) + b_ref[...]
        obs_ref[b] = y[:l_obs, :c_out]
        rew_ref[pl.ds(b, 1), :] = y[l_obs:, c_out:]


def pallas_heads(x, w_head, b_head, l_obs, c_out):
    N, L, D = x.shape
    kernel = functools.partial(_head_kernel, l_obs=l_obs, c_out=c_out)
    return pl.pallas_call(
        kernel,
        out_shape=(jax.ShapeDtypeStruct((N, l_obs, c_out), jnp.float32),
                   jax.ShapeDtypeStruct((N, 1), jnp.float32)),
    )(x, w_head, b_head)


# ----------------------------- forward (minimal JAX glue) -----------------------------

def comb_action_forward(x_obs, x_action, params, cfg):
    H, W, Cin = cfg["in_obs_shape"]
    out_obs_shape = cfg["out_obs_shape"]
    Cout = out_obs_shape[-1]
    n_heads = cfg["n_heads"]
    threshold = cfg["threshold"]
    N = x_obs.shape[0]
    L_obs = H * W
    L = L_obs + 1

    x_obs_flat = x_obs.astype(jnp.float32).reshape(N, L_obs, Cin)
    x_act = x_action.astype(jnp.float32)

    x = pallas_embed(x_obs_flat, x_act, params)                  # [N, L, D]

    attention_sum = jnp.zeros((N, L, L), jnp.float32)
    eta = jnp.tile(jnp.eye(L, dtype=jnp.float32)[None], (N, 1, 1))

    for lp in params["layers"]:
        x, attention_sum, eta = pallas_layer(x, attention_sum, eta, lp, n_heads, threshold)

    pred_obs_flat, pred_reward = pallas_heads(x, params["head_w"], params["head_b"],
                                              L_obs, Cout)
    pred_obs = pred_obs_flat.reshape(N, *out_obs_shape)
    return {"pred_obs": pred_obs, "pred_reward": pred_reward,
            "eta": eta, "attention_sum": attention_sum}


# ----------------------------- deterministic parameter init -----------------------------
# Weights are pre-fused / pre-reshaped here so the forward pass has no XLA reshapes/concats.

def init_params(key, cfg):
    d_model, d_ff, n_layers = cfg["d_model"], cfg["d_ff"], cfg["n_layers"]
    Cin = cfg["in_obs_shape"][-1]
    Cout = cfg["out_obs_shape"][-1]
    A = cfg["action_dim"]
    in_dim = Cin + A
    L = cfg["in_obs_shape"][0] * cfg["in_obs_shape"][1] + 1

    def lin(k, fan_in, fan_out):
        kw, kb = jax.random.split(k)
        bound = 1.0 / math.sqrt(fan_in)
        w = jax.random.uniform(kw, (fan_in, fan_out), jnp.float32, -bound, bound)
        b = jax.random.uniform(kb, (1, fan_out), jnp.float32, -bound, bound)
        return w, b

    keys = jax.random.split(key, 4 + n_layers)
    p = {}
    in_w, in_b = lin(keys[0], in_dim, d_model)
    p["in_w_obs"], p["in_w_act"], p["in_b"] = in_w[:Cin], in_w[Cin:], in_b
    p["reward_token"] = jax.random.normal(keys[1], (1, d_model), jnp.float32)
    # TODO(synk): PositionalEncoding class not provided; 'learned' type modelled as a
    #             randomly-initialized learned table of shape (L, d_model).
    p["pos_encoding"] = jax.random.normal(keys[2], (L, d_model), jnp.float32) * 0.02
    obs_w, obs_b = lin(keys[3], d_model, Cout)
    rew_w, rew_b = lin(jax.random.fold_in(keys[3], 7), d_model, 1)
    p["head_w"] = jnp.concatenate([obs_w, rew_w], axis=1)        # fused [D, Cout+1]
    p["head_b"] = jnp.concatenate([obs_b, rew_b], axis=1)        # fused [1, Cout+1]

    layers = []
    for i in range(n_layers):
        lk = jax.random.split(keys[4 + i], 6)
        lp = {}
        wq, bq = lin(lk[0], d_model, d_model)
        wk, bk = lin(lk[1], d_model, d_model)
        wv, bv = lin(lk[2], d_model, d_model)
        lp["wqkv"] = jnp.concatenate([wq, wk, wv], axis=1)       # fused [D, 3D]
        lp["bqkv"] = jnp.concatenate([bq, bk, bv], axis=1)       # fused [1, 3D]
        lp["wo"], lp["bo"] = lin(lk[3], d_model, d_model)
        lp["w1"], lp["b1"] = lin(lk[4], d_model, d_ff)
        lp["w2"], lp["b2"] = lin(lk[5], d_ff, d_model)
        lp["ln1_g"] = jnp.ones((1, d_model), jnp.float32)
        lp["ln1_b"] = jnp.zeros((1, d_model), jnp.float32)
        lp["ln2_g"] = jnp.ones((1, d_model), jnp.float32)
        lp["ln2_b"] = jnp.zeros((1, d_model), jnp.float32)
        layers.append(lp)
    p["layers"] = layers
    return p


# ----------------------------- main -----------------------------

if __name__ == "__main__":
    cfg = dict(
        in_obs_shape=(4, 4, 3),     # (H, W, C_in)  -> 16 obs tokens
        out_obs_shape=(4, 4, 2),    # (H, W, C_out)
        action_dim=5,
        d_model=32,
        n_heads=4,
        n_layers=2,
        d_ff=64,
        threshold=0.1,
    )

    key = jax.random.PRNGKey(0)
    k_obs, k_act, k_param = jax.random.split(key, 3)
    N = 2
    x_obs = jax.random.normal(k_obs, (N, *cfg["in_obs_shape"]), jnp.float32)   # [N, H, W, C]
    x_action = jax.random.normal(k_act, (N, cfg["action_dim"]), jnp.float32)   # [N, A]
    params = init_params(k_param, cfg)

    fwd = jax.jit(lambda xo, xa, p: comb_action_forward(xo, xa, p, cfg))
    out = fwd(x_obs, x_action, params)
    jax.block_until_ready(out)

    L = cfg["in_obs_shape"][0] * cfg["in_obs_shape"][1] + 1
    assert out["pred_obs"].shape == (N, *cfg["out_obs_shape"])
    assert out["pred_reward"].shape == (N, 1)
    assert out["eta"].shape == (N, L, L)
    assert out["attention_sum"].shape == (N, L, L)
    print("KERNEL_OK")
</pallas_src>

<mosaic_0001>
module attributes {stable_mosaic.version = 11 : i64} {
  func.func @_embed_kernel(%arg0: memref<2x16x3xf32, #tpu.memory_space<vmem>>, %arg1: memref<2x5xf32, #tpu.memory_space<vmem>>, %arg2: memref<3x32xf32, #tpu.memory_space<vmem>>, %arg3: memref<5x32xf32, #tpu.memory_space<vmem>>, %arg4: memref<1x32xf32, #tpu.memory_space<vmem>>, %arg5: memref<1x32xf32, #tpu.memory_space<vmem>>, %arg6: memref<17x32xf32, #tpu.memory_space<vmem>>, %arg7: memref<2x17x32xf32, #tpu.memory_space<vmem>>) attributes {dimension_semantics = [], scalar_prefetch = 0 : i64, scratch_operands = 0 : i64, tpu.core_type = #tpu.core_type<tc>} {
    %c0 = arith.constant 0 : index
    %c0_0 = arith.constant 0 : index
    %0 = vector.load %arg1[%c0, %c0_0] : memref<2x5xf32, #tpu.memory_space<vmem>>, vector<2x5xf32>
    %c0_1 = arith.constant 0 : index
    %c0_2 = arith.constant 0 : index
    %1 = vector.load %arg3[%c0_1, %c0_2] : memref<5x32xf32, #tpu.memory_space<vmem>>, vector<5x32xf32>
    %cst = arith.constant dense<0.000000e+00> : vector<2x32xf32>
    %2 = tpu.matmul %0, %1, %cst {dimension_numbers = #tpu.dot_dimension_numbers<[1], [0], [0], [1], [0, 0, 1, 1], [], []>} : vector<2x5xf32>, vector<5x32xf32>, vector<2x32xf32> -> vector<2x32xf32>
    %c0_3 = arith.constant 0 : index
    %c0_4 = arith.constant 0 : index
    %3 = vector.load %arg4[%c0_3, %c0_4] : memref<1x32xf32, #tpu.memory_space<vmem>>, vector<1x32xf32>
    %4 = vector.broadcast %3 : vector<1x32xf32> to vector<2x32xf32>
    %5 = arith.addf %2, %4 : vector<2x32xf32>
    %c0_5 = arith.constant 0 : index
    %c0_6 = arith.constant 0 : index
    %6 = vector.load %arg5[%c0_5, %c0_6] : memref<1x32xf32, #tpu.memory_space<vmem>>, vector<1x32xf32>
    %c16 = arith.constant 16 : index
    %c0_7 = arith.constant 0 : index
    %7 = vector.load %arg6[%c16, %c0_7] : memref<17x32xf32, #tpu.memory_space<vmem>>, vector<1x32xf32>
    %8 = arith.addf %6, %7 : vector<1x32xf32>
    %c0_8 = arith.constant 0 : index
    %c0_9 = arith.constant 0 : index
    %9 = vector.load %arg6[%c0_8, %c0_9] : memref<17x32xf32, #tpu.memory_space<vmem>>, vector<16x32xf32>
    %c0_10 = arith.constant 0 : index
    %c0_11 = arith.constant 0 : index
    %c0_12 = arith.constant 0 : index
    %10 = vector.load %arg0[%c0_10, %c0_11, %c0_12] : memref<2x16x3xf32, #tpu.memory_space<vmem>>, vector<1x16x3xf32>
    %11 = vector.shape_cast %10 : vector<1x16x3xf32> to vector<16x3xf32>
    %c0_13 = arith.constant 0 : index
    %c0_14 = arith.constant 0 : index
    %12 = vector.load %arg2[%c0_13, %c0_14] : memref<3x32xf32, #tpu.memory_space<vmem>>, vector<3x32xf32>
    %cst_15 = arith.constant dense<0.000000e+00> : vector<16x32xf32>
    %13 = tpu.matmul %11, %12, %cst_15 {dimension_numbers = #tpu.dot_dimension_numbers<[1], [0], [0], [1], [0, 0, 1, 1], [], []>} : vector<16x3xf32>, vector<3x32xf32>, vector<16x32xf32> -> vector<16x32xf32>
    %14 = vector.extract_strided_slice %5 {offsets = [0, 0], sizes = [1, 32], strides = [1, 1]} : vector<2x32xf32> to vector<1x32xf32>
    %15 = vector.broadcast %14 : vector<1x32xf32> to vector<16x32xf32>
    %16 = arith.addf %13, %15 : vector<16x32xf32>
    %17 = arith.addf %16, %9 : vector<16x32xf32>
    %c0_16 = arith.constant 0 : index
    %c0_17 = arith.constant 0 : index
    %c0_18 = arith.constant 0 : index
    %18 = vector.load %arg7[%c0_16, %c0_17, %c0_18] : memref<2x17x32xf32, #tpu.memory_space<vmem>>, vector<1x16x32xf32>
    %19 = vector.shape_cast %18 : vector<1x16x32xf32> to vector<16x32xf32>
    %20 = vector.shape_cast %17 : vector<16x32xf32> to vector<1x16x32xf32>
    tpu.vector_store %arg7[%c0_16, %c0_17, %c0_18], %20 {strides = array<i32>} : memref<2x17x32xf32, #tpu.memory_space<vmem>>, vector<1x16x32xf32>,
    %c0_19 = arith.constant 0 : index
    %c16_20 = arith.constant 16 : index
    %c0_21 = arith.constant 0 : index
    %21 = vector.load %arg7[%c0_19, %c16_20, %c0_21] : memref<2x17x32xf32, #tpu.memory_space<vmem>>, vector<1x1x32xf32>
    %22 = vector.shape_cast %21 : vector<1x1x32xf32> to vector<1x32xf32>
    %23 = vector.shape_cast %8 : vector<1x32xf32> to vector<1x1x32xf32>
    tpu.vector_store %arg7[%c0_19, %c16_20, %c0_21], %23 {strides = array<i32>} : memref<2x17x32xf32, #tpu.memory_space<vmem>>, vector<1x1x32xf32>,
    %c1 = arith.constant 1 : index
    %c0_22 = arith.constant 0 : index
    %c0_23 = arith.constant 0 : index
    %24 = vector.load %arg0[%c1, %c0_22, %c0_23] : memref<2x16x3xf32, #tpu.memory_space<vmem>>, vector<1x16x3xf32>
    %25 = vector.shape_cast %24 : vector<1x16x3xf32> to vector<16x3xf32>
    %c0_24 = arith.constant 0 : index
    %c0_25 = arith.constant 0 : index
    %26 = vector.load %arg2[%c0_24, %c0_25] : memref<3x32xf32, #tpu.memory_space<vmem>>, vector<3x32xf32>
    %cst_26 = arith.constant dense<0.000000e+00> : vector<16x32xf32>
    %27 = tpu.matmul %25, %26, %cst_26 {dimension_numbers = #tpu.dot_dimension_numbers<[1], [0], [0], [1], [0, 0, 1, 1], [], []>} : vector<16x3xf32>, vector<3x32xf32>, vector<16x32xf32> -> vector<16x32xf32>
    %28 = vector.extract_strided_slice %5 {offsets = [1, 0], sizes = [1, 32], strides = [1, 1]} : vector<2x32xf32> to vector<1x32xf32>
    %29 = vector.broadcast %28 : vector<1x32xf32> to vector<16x32xf32>
    %30 = arith.addf %27, %29 : vector<16x32xf32>
    %31 = arith.addf %30, %9 : vector<16x32xf32>
    %c1_27 = arith.constant 1 : index
    %c0_28 = arith.constant 0 : index
    %c0_29 = arith.constant 0 : index
    %32 = vector.load %arg7[%c1_27, %c0_28, %c0_29] : memref<2x17x32xf32, #tpu.memory_space<vmem>>, vector<1x16x32xf32>
    %33 = vector.shape_cast %32 : vector<1x16x32xf32> to vector<16x32xf32>
    %34 = vector.shape_cast %31 : vector<16x32xf32> to vector<1x16x32xf32>
    tpu.vector_store %arg7[%c1_27, %c0_28, %c0_29], %34 {strides = array<i32>} : memref<2x17x32xf32, #tpu.memory_space<vmem>>, vector<1x16x32xf32>,
    %c1_30 = arith.constant 1 : index
    %c16_31 = arith.constant 16 : index
    %c0_32 = arith.constant 0 : index
    %35 = vector.load %arg7[%c1_30, %c16_31, %c0_32] : memref<2x17x32xf32, #tpu.memory_space<vmem>>, vector<1x1x32xf32>
    %36 = vector.shape_cast %35 : vector<1x1x32xf32> to vector<1x32xf32>
    %37 = vector.shape_cast %8 : vector<1x32xf32> to vector<1x1x32xf32>
    tpu.vector_store %arg7[%c1_30, %c16_31, %c0_32], %37 {strides = array<i32>} : memref<2x17x32xf32, #tpu.memory_space<vmem>>, vector<1x1x32xf32>,
    return
  }
}

module attributes {stable_mosaic.version = 11 : i64} {
  func.func @_layer_kernel(%arg0: i32, %arg1: memref<1x17x32xf32, #tpu.memory_space<vmem>>, %arg2: memref<1x17x17xf32, #tpu.memory_space<vmem>>, %arg3: memref<1x17x17xf32, #tpu.memory_space<vmem>>, %arg4: memref<32x96xf32, #tpu.memory_space<vmem>>, %arg5: memref<1x96xf32, #tpu.memory_space<vmem>>, %arg6: memref<32x32xf32, #tpu.memory_space<vmem>>, %arg7: memref<1x32xf32, #tpu.memory_space<vmem>>, %arg8: memref<1x32xf32, #tpu.memory_space<vmem>>, %arg9: memref<1x32xf32, #tpu.memory_space<vmem>>, %arg10: memref<32x64xf32, #tpu.memory_space<vmem>>, %arg11: memref<1x64xf32, #tpu.memory_space<vmem>>, %arg12: memref<64x32xf32, #tpu.memory_space<vmem>>, %arg13: memref<1x32xf32, #tpu.memory_space<vmem>>, %arg14: memref<1x32xf32, #tpu.memory_space<vmem>>, %arg15: memref<1x32xf32, #tpu.memory_space<vmem>>, %arg16: memref<1x17x32xf32, #tpu.memory_space<vmem>>, %arg17: memref<1x17x17xf32, #tpu.memory_space<vmem>>, %arg18: memref<1x17x17xf32, #tpu.memory_space<vmem>>) attributes {dimension_semantics = [#tpu.dimension_semantics<parallel>], iteration_bounds = array<i64: 2>, scalar_prefetch = 0 : i64, scratch_operands = 0 : i64, tpu.core_type = #tpu.core_type<tc>, window_params = [{transform_indices = @transform_0, window_bounds = array<i64: 1, 17, 32>}, {transform_indices = @transform_1, window_bounds = array<i64: 1, 17, 17>}, {transform_indices = @transform_2, window_bounds = array<i64: 1, 17, 17>}, {pipeline_mode = #tpu.pipeline_mode<synchronous>, transform_indices = @transform_3, window_bounds = array<i64: 32, 96>}, {pipeline_mode = #tpu.pipeline_mode<synchronous>, transform_indices = @transform_4, window_bounds = array<i64: 1, 96>}, {pipeline_mode = #tpu.pipeline_mode<synchronous>, transform_indices = @transform_5, window_bounds = array<i64: 32, 32>}, {pipeline_mode = #tpu.pipeline_mode<synchronous>, transform_indices = @transform_6, window_bounds = array<i64: 1, 32>}, {pipeline_mode = #tpu.pipeline_mode<synchronous>, transform_indices = @transform_7, window_bounds = array<i64: 1, 32>}, {pipeline_mode = #tpu.pipeline_mode<synchronous>, transform_indices = @transform_8, window_bounds = array<i64: 1, 32>}, {pipeline_mode = #tpu.pipeline_mode<synchronous>, transform_indices = @transform_9, window_bounds = array<i64: 32, 64>}, {pipeline_mode = #tpu.pipeline_mode<synchronous>, transform_indices = @transform_10, window_bounds = array<i64: 1, 64>}, {pipeline_mode = #tpu.pipeline_mode<synchronous>, transform_indices = @transform_11, window_bounds = array<i64: 64, 32>}, {pipeline_mode = #tpu.pipeline_mode<synchronous>, transform_indices = @transform_12, window_bounds = array<i64: 1, 32>}, {pipeline_mode = #tpu.pipeline_mode<synchronous>, transform_indices = @transform_13, window_bounds = array<i64: 1, 32>}, {pipeline_mode = #tpu.pipeline_mode<synchronous>, transform_indices = @transform_14, window_bounds = array<i64: 1, 32>}, {transform_indices = @transform_15, window_bounds = array<i64: 1, 17, 32>}, {transform_indices = @transform_16, window_bounds = array<i64: 1, 17, 17>}, {transform_indices = @transform_17, window_bounds = array<i64: 1, 17, 17>}]} {
    %c0 = arith.constant 0 : index
    %c0_0 = arith.constant 0 : index
    %c0_1 = arith.constant 0 : index
    %0 = vector.load %arg1[%c0, %c0_0, %c0_1] : memref<1x17x32xf32, #tpu.memory_space<vmem>>, vector<1x17x32xf32>
    %1 = vector.shape_cast %0 : vector<1x17x32xf32> to vector<17x32xf32>
    %c0_2 = arith.constant 0 : index
    %c0_3 = arith.constant 0 : index
    %2 = vector.load %arg4[%c0_2, %c0_3] : memref<32x96xf32, #tpu.memory_space<vmem>>, vector<32x96xf32>
    %cst = arith.constant dense<0.000000e+00> : vector<17x96xf32>
    %3 = tpu.matmul %1, %2, %cst {dimension_numbers = #tpu.dot_dimension_numbers<[1], [0], [0], [1], [0, 0, 1, 1], [], []>} : vector<17x32xf32>, vector<32x96xf32>, vector<17x96xf32> -> vector<17x96xf32>
    %c0_4 = arith.constant 0 : index
    %c0_5 = arith.constant 0 : index
    %4 = vector.load %arg5[%c0_4, %c0_5] : memref<1x96xf32, #tpu.memory_space<vmem>>, vector<1x96xf32>
    %5 = vector.broadcast %4 : vector<1x96xf32> to vector<17x96xf32>
    %6 = arith.addf %3, %5 : vector<17x96xf32>
    %7 = vector.extract_strided_slice %6 {offsets = [0, 0], sizes = [17, 32], strides = [1, 1]} : vector<17x96xf32> to vector<17x32xf32>
    %8 = vector.extract_strided_slice %6 {offsets = [0, 32], sizes = [17, 32], strides = [1, 1]} : vector<17x96xf32> to vector<17x32xf32>
    %9 = vector.extract_strided_slice %6 {offsets = [0, 64], sizes = [17, 32], strides = [1, 1]} : vector<17x96xf32> to vector<17x32xf32>
    %cst_6 = arith.constant 0.000000e+00 : f32
    %10 = vector.broadcast %cst_6 : f32 to vector<17x17xf32>
    %cst_7 = arith.constant 0.000000e+00 : f32
    %11 = vector.broadcast %cst_7 : f32 to vector<17x17xf32>
    %12 = vector.extract_strided_slice %7 {offsets = [0, 0], sizes = [17, 8], strides = [1, 1]} : vector<17x32xf32> to vector<17x8xf32>
    %13 = vector.extract_strided_slice %8 {offsets = [0, 0], sizes = [17, 8], strides = [1, 1]} : vector<17x32xf32> to vector<17x8xf32>
    %14 = vector.extract_strided_slice %9 {offsets = [0, 0], sizes = [17, 8], strides = [1, 1]} : vector<17x32xf32> to vector<17x8xf32>
    %cst_8 = arith.constant dense<0.000000e+00> : vector<17x17xf32>
    %15 = tpu.matmul %12, %13, %cst_8 {dimension_numbers = #tpu.dot_dimension_numbers<[1], [1], [0], [0], [0, 0, 1, 0], [], []>} : vector<17x8xf32>, vector<17x8xf32>, vector<17x17xf32> -> vector<17x17xf32>
    %cst_9 = arith.constant 0.353553385 : f32
    %16 = vector.broadcast %cst_9 : f32 to vector<17x17xf32>
    %17 = arith.mulf %15, %16 : vector<17x17xf32>
    %cst_10 = arith.constant dense<0xFF800000> : vector<17xf32>
    %18 = vector.multi_reduction <maximumf>, %17, %cst_10 [1] : vector<17x17xf32> to vector<17xf32>
    %19 = vector.shape_cast %18 : vector<17xf32> to vector<17x1xf32>
    %20 = vector.broadcast %19 : vector<17x1xf32> to vector<17x17xf32>
    %21 = arith.subf %17, %20 : vector<17x17xf32>
    %22 = math.exp %21 : vector<17x17xf32>
    %cst_11 = arith.constant dense<0.000000e+00> : vector<17xf32>
    %23 = vector.multi_reduction <add>, %22, %cst_11 [1] : vector<17x17xf32> to vector<17xf32>
    %24 = vector.shape_cast %23 : vector<17xf32> to vector<17x1xf32>
    %25 = tpu.reciprocal %24 {approx = true} : vector<17x1xf32> -> vector<17x1xf32>
    %26 = vector.broadcast %25 : vector<17x1xf32> to vector<17x17xf32>
    %27 = arith.mulf %22, %26 : vector<17x17xf32>
    %cst_12 = arith.constant 1.000000e-01 : f32
    %28 = vector.broadcast %cst_12 : f32 to vector<17x17xf32>
    %29 = arith.cmpf oge, %27, %28 : vector<17x17xf32>
    %cst_13 = arith.constant 0.000000e+00 : f32
    %30 = vector.broadcast %cst_13 : f32 to vector<17x17xf32>
    %31 = arith.select %29, %27, %30 : vector<17x17xi1>, vector<17x17xf32>
    %cst_14 = arith.constant dense<0.000000e+00> : vector<17x8xf32>
    %32 = tpu.matmul %31, %14, %cst_14 {dimension_numbers = #tpu.dot_dimension_numbers<[1], [0], [0], [1], [0, 0, 1, 1], [], []>} : vector<17x17xf32>, vector<17x8xf32>, vector<17x8xf32> -> vector<17x8xf32>
    %33 = arith.addf %10, %27 : vector<17x17xf32>
    %34 = arith.extui %29 : vector<17x17xi1> to vector<17x17xi32>
    %35 = arith.sitofp %34 : vector<17x17xi32> to vector<17x17xf32>
    %36 = arith.addf %11, %35 : vector<17x17xf32>
    %37 = vector.extract_strided_slice %7 {offsets = [0, 8], sizes = [17, 8], strides = [1, 1]} : vector<17x32xf32> to vector<17x8xf32>
    %38 = vector.extract_strided_slice %8 {offsets = [0, 8], sizes = [17, 8], strides = [1, 1]} : vector<17x32xf32> to vector<17x8xf32>
    %39 = vector.extract_strided_slice %9 {offsets = [0, 8], sizes = [17, 8], strides = [1, 1]} : vector<17x32xf32> to vector<17x8xf32>
    %cst_15 = arith.constant dense<0.000000e+00> : vector<17x17xf32>
    %40 = tpu.matmul %37, %38, %cst_15 {dimension_numbers = #tpu.dot_dimension_numbers<[1], [1], [0], [0], [0, 0, 1, 0], [], []>} : vector<17x8xf32>, vector<17x8xf32>, vector<17x17xf32> -> vector<17x17xf32>
    %cst_16 = arith.constant 0.353553385 : f32
    %41 = vector.broadcast %cst_16 : f32 to vector<17x17xf32>
    %42 = arith.mulf %40, %41 : vector<17x17xf32>
    %cst_17 = arith.constant dense<0xFF800000> : vector<17xf32>
    %43 = vector.multi_reduction <maximumf>, %42, %cst_17 [1] : vector<17x17xf32> to vector<17xf32>
    %44 = vector.shape_cast %43 : vector<17xf32> to vector<17x1xf32>
    %45 = vector.broadcast %44 : vector<17x1xf32> to vector<17x17xf32>
    %46 = arith.subf %42, %45 : vector<17x17xf32>
    %47 = math.exp %46 : vector<17x17xf32>
    %cst_18 = arith.constant dense<0.000000e+00> : vector<17xf32>
    %48 = vector.multi_reduction <add>, %47, %cst_18 [1] : vector<17x17xf32> to vector<17xf32>
    %49 = vector.shape_cast %48 : vector<17xf32> to vector<17x1xf32>
    %50 = tpu.reciprocal %49 {approx = true} : vector<17x1xf32> -> vector<17x1xf32>
    %51 = vector.broadcast %50 : vector<17x1xf32> to vector<17x17xf32>
    %52 = arith.mulf %47, %51 : vector<17x17xf32>
    %cst_19 = arith.constant 1.000000e-01 : f32
    %53 = vector.broadcast %cst_19 : f32 to vector<17x17xf32>
    %54 = arith.cmpf oge, %52, %53 : vector<17x17xf32>
    %cst_20 = arith.constant 0.000000e+00 : f32
    %55 = vector.broadcast %cst_20 : f32 to vector<17x17xf32>
    %56 = arith.select %54, %52, %55 : vector<17x17xi1>, vector<17x17xf32>
    %cst_21 = arith.constant dense<0.000000e+00> : vector<17x8xf32>
    %57 = tpu.matmul %56, %39, %cst_21 {dimension_numbers = #tpu.dot_dimension_numbers<[1], [0], [0], [1], [0, 0, 1, 1], [], []>} : vector<17x17xf32>, vector<17x8xf32>, vector<17x8xf32> -> vector<17x8xf32>
    %58 = arith.addf %33, %52 : vector<17x17xf32>
    %59 = arith.extui %54 : vector<17x17xi1> to vector<17x17xi32>
    %60 = arith.sitofp %59 : vector<17x17xi32> to vector<17x17xf32>
    %61 = arith.addf %36, %60 : vector<17x17xf32>
    %62 = vector.extract_strided_slice %7 {offsets = [0, 16], sizes = [17, 8], strides = [1, 1]} : vector<17x32xf32> to vector<17x8xf32>
    %63 = vector.extract_strided_slice %8 {offsets = [0, 16], sizes = [17, 8], strides = [1, 1]} : vector<17x32xf32> to vector<17x8xf32>
    %64 = vector.extract_strided_slice %9 {offsets = [0, 16], sizes = [17, 8], strides = [1, 1]} : vector<17x32xf32> to vector<17x8xf32>
    %cst_22 = arith.constant dense<0.000000e+00> : vector<17x17xf32>
    %65 = tpu.matmul %62, %63, %cst_22 {dimension_numbers = #tpu.dot_dimension_numbers<[1], [1], [0], [0], [0, 0, 1, 0], [], []>} : vector<17x8xf32>, vector<17x8xf32>, vector<17x17xf32> -> vector<17x17xf32>
    %cst_23 = arith.constant 0.353553385 : f32
    %66 = vector.broadcast %cst_23 : f32 to vector<17x17xf32>
    %67 = arith.mulf %65, %66 : vector<17x17xf32>
    %cst_24 = arith.constant dense<0xFF800000> : vector<17xf32>
    %68 = vector.multi_reduction <maximumf>, %67, %cst_24 [1] : vector<17x17xf32> to vector<17xf32>
    %69 = vector.shape_cast %68 : vector<17xf32> to vector<17x1xf32>
    %70 = vector.broadcast %69 : vector<17x1xf32> to vector<17x17xf32>
    %71 = arith.subf %67, %70 : vector<17x17xf32>
    %72 = math.exp %71 : vector<17x17xf32>
    %cst_25 = arith.constant dense<0.000000e+00> : vector<17xf32>
    %73 = vector.multi_reduction <add>, %72, %cst_25 [1] : vector<17x17xf32> to vector<17xf32>
    %74 = vector.shape_cast %73 : vector<17xf32> to vector<17x1xf32>
    %75 = tpu.reciprocal %74 {approx = true} : vector<17x1xf32> -> vector<17x1xf32>
    %76 = vector.broadcast %75 : vector<17x1xf32> to vector<17x17xf32>
    %77 = arith.mulf %72, %76 : vector<17x17xf32>
    %cst_26 = arith.constant 1.000000e-01 : f32
    %78 = vector.broadcast %cst_26 : f32 to vector<17x17xf32>
    %79 = arith.cmpf oge, %77, %78 : vector<17x17xf32>
    %cst_27 = arith.constant 0.000000e+00 : f32
    %80 = vector.broadcast %cst_27 : f32 to vector<17x17xf32>
    %81 = arith.select %79, %77, %80 : vector<17x17xi1>, vector<17x17xf32>
    %cst_28 = arith.constant dense<0.000000e+00> : vector<17x8xf32>
    %82 = tpu.matmul %81, %64, %cst_28 {dimension_numbers = #tpu.dot_dimension_numbers<[1], [0], [0], [1], [0, 0, 1, 1], [], []>} : vector<17x17xf32>, vector<17x8xf32>, vector<17x8xf32> -> vector<17x8xf32>
    %83 = arith.addf %58, %77 : vector<17x17xf32>
    %84 = arith.extui %79 : vector<17x17xi1> to vector<17x17xi32>
    %85 = arith.sitofp %84 : vector<17x17xi32> to vector<17x17xf32>
    %86 = arith.addf %61, %85 : vector<17x17xf32>
    %87 = vector.extract_strided_slice %7 {offsets = [0, 24], sizes = [17, 8], strides = [1, 1]} : vector<17x32xf32> to vector<17x8xf32>
    %88 = vector.extract_strided_slice %8 {offsets = [0, 24], sizes = [17, 8], strides = [1, 1]} : vector<17x32xf32> to vector<17x8xf32>
    %89 = vector.extract_strided_slice %9 {offsets = [0, 24], sizes = [17, 8], strides = [1, 1]} : vector<17x32xf32> to vector<17x8xf32>
    %cst_29 = arith.constant dense<0.000000e+00> : vector<17x17xf32>
    %90 = tpu.matmul %87, %88, %cst_29 {dimension_numbers = #tpu.dot_dimension_numbers<[1], [1], [0], [0], [0, 0, 1, 0], [], []>} : vector<17x8xf32>, vector<17x8xf32>, vector<17x17xf32> -> vector<17x17xf32>
    %cst_30 = arith.constant 0.353553385 : f32
    %91 = vector.broadcast %cst_30 : f32 to vector<17x17xf32>
    %92 = arith.mulf %90, %91 : vector<17x17xf32>
    %cst_31 = arith.constant dense<0xFF800000> : vector<17xf32>
    %93 = vector.multi_reduction <maximumf>, %92, %cst_31 [1] : vector<17x17xf32> to vector<17xf32>
    %94 = vector.shape_cast %93 : vector<17xf32> to vector<17x1xf32>
    %95 = vector.broadcast %94 : vector<17x1xf32> to vector<17x17xf32>
    %96 = arith.subf %92, %95 : vector<17x17xf32>
    %97 = math.exp %96 : vector<17x17xf32>
    %cst_32 = arith.constant dense<0.000000e+00> : vector<17xf32>
    %98 = vector.multi_reduction <add>, %97, %cst_32 [1] : vector<17x17xf32> to vector<17xf32>
    %99 = vector.shape_cast %98 : vector<17xf32> to vector<17x1xf32>
    %100 = tpu.reciprocal %99 {approx = true} : vector<17x1xf32> -> vector<17x1xf32>
    %101 = vector.broadcast %100 : vector<17x1xf32> to vector<17x17xf32>
    %102 = arith.mulf %97, %101 : vector<17x17xf32>
    %cst_33 = arith.constant 1.000000e-01 : f32
    %103 = vector.broadcast %cst_33 : f32 to vector<17x17xf32>
    %104 = arith.cmpf oge, %102, %103 : vector<17x17xf32>
    %cst_34 = arith.constant 0.000000e+00 : f32
    %105 = vector.broadcast %cst_34 : f32 to vector<17x17xf32>
    %106 = arith.select %104, %102, %105 : vector<17x17xi1>, vector<17x17xf32>
    %cst_35 = arith.constant dense<0.000000e+00> : vector<17x8xf32>
    %107 = tpu.matmul %106, %89, %cst_35 {dimension_numbers = #tpu.dot_dimension_numbers<[1], [0], [0], [1], [0, 0, 1, 1], [], []>} : vector<17x17xf32>, vector<17x8xf32>, vector<17x8xf32> -> vector<17x8xf32>
    %108 = arith.addf %83, %102 : vector<17x17xf32>
    %109 = arith.extui %104 : vector<17x17xi1> to vector<17x17xi32>
    %110 = arith.sitofp %109 : vector<17x17xi32> to vector<17x17xf32>
    %111 = arith.addf %86, %110 : vector<17x17xf32>
    %112 = tpu.concatenate %32, %57, %82, %107 in 1 : vector<17x8xf32>, vector<17x8xf32>, vector<17x8xf32>, vector<17x8xf32> -> vector<17x32xf32>
    %c0_36 = arith.constant 0 : index
    %c0_37 = arith.constant 0 : index
    %113 = vector.load %arg6[%c0_36, %c0_37] : memref<32x32xf32, #tpu.memory_space<vmem>>, vector<32x32xf32>
    %cst_38 = arith.constant dense<0.000000e+00> : vector<17x32xf32>
    %114 = tpu.matmul %112, %113, %cst_38 {dimension_numbers = #tpu.dot_dimension_numbers<[1], [0], [0], [1], [0, 0, 1, 1], [], []>} : vector<17x32xf32>, vector<32x32xf32>, vector<17x32xf32> -> vector<17x32xf32>
    %c0_39 = arith.constant 0 : index
    %c0_40 = arith.constant 0 : index
    %115 = vector.load %arg7[%c0_39, %c0_40] : memref<1x32xf32, #tpu.memory_space<vmem>>, vector<1x32xf32>
    %116 = vector.broadcast %115 : vector<1x32xf32> to vector<17x32xf32>
    %117 = arith.addf %114, %116 : vector<17x32xf32>
    %118 = arith.addf %1, %117 : vector<17x32xf32>
    %c0_41 = arith.constant 0 : index
    %c0_42 = arith.constant 0 : index
    %119 = vector.load %arg8[%c0_41, %c0_42] : memref<1x32xf32, #tpu.memory_space<vmem>>, vector<1x32xf32>
    %c0_43 = arith.constant 0 : index
    %c0_44 = arith.constant 0 : index
    %120 = vector.load %arg9[%c0_43, %c0_44] : memref<1x32xf32, #tpu.memory_space<vmem>>, vector<1x32xf32>
    %cst_45 = arith.constant dense<0.000000e+00> : vector<17xf32>
    %121 = vector.multi_reduction <add>, %118, %cst_45 [1] : vector<17x32xf32> to vector<17xf32>
    %122 = vector.shape_cast %121 : vector<17xf32> to vector<17x1xf32>
    %cst_46 = arith.constant 3.200000e+01 : f32
    %123 = vector.broadcast %cst_46 : f32 to vector<17x1xf32>
    %124 = arith.divf %122, %123 : vector<17x1xf32>
    %125 = vector.broadcast %124 : vector<17x1xf32> to vector<17x32xf32>
    %126 = arith.subf %118, %125 : vector<17x32xf32>
    %127 = arith.mulf %126, %126 : vector<17x32xf32>
    %cst_47 = arith.constant dense<0.000000e+00> : vector<17xf32>
    %128 = vector.multi_reduction <add>, %127, %cst_47 [1] : vector<17x32xf32> to vector<17xf32>
    %129 = vector.shape_cast %128 : vector<17xf32> to vector<17x1xf32>
    %cst_48 = arith.constant 3.200000e+01 : f32
    %130 = vector.broadcast %cst_48 : f32 to vector<17x1xf32>
    %131 = arith.divf %129, %130 : vector<17x1xf32>
    %132 = vector.broadcast %124 : vector<17x1xf32> to vector<17x32xf32>
    %133 = arith.subf %118, %132 : vector<17x32xf32>
    %cst_49 = arith.constant 9.99999974E-6 : f32
    %134 = vector.broadcast %cst_49 : f32 to vector<17x1xf32>
    %135 = arith.addf %131, %134 : vector<17x1xf32>
    %136 = math.rsqrt %135 : vector<17x1xf32>
    %137 = vector.broadcast %136 : vector<17x1xf32> to vector<17x32xf32>
    %138 = arith.mulf %133, %137 : vector<17x32xf32>
    %139 = vector.broadcast %119 : vector<1x32xf32> to vector<17x32xf32>
    %140 = arith.mulf %138, %139 : vector<17x32xf32>
    %141 = vector.broadcast %120 : vector<1x32xf32> to vector<17x32xf32>
    %142 = arith.addf %140, %141 : vector<17x32xf32>
    %c0_50 = arith.constant 0 : index
    %c0_51 = arith.constant 0 : index
    %143 = vector.load %arg10[%c0_50, %c0_51] : memref<32x64xf32, #tpu.memory_space<vmem>>, vector<32x64xf32>
    %cst_52 = arith.constant dense<0.000000e+00> : vector<17x64xf32>
    %144 = tpu.matmul %142, %143, %cst_52 {dimension_numbers = #tpu.dot_dimension_numbers<[1], [0], [0], [1], [0, 0, 1, 1], [], []>} : vector<17x32xf32>, vector<32x64xf32>, vector<17x64xf32> -> vector<17x64xf32>
    %c0_53 = arith.constant 0 : index
    %c0_54 = arith.constant 0 : index
    %145 = vector.load %arg11[%c0_53, %c0_54] : memref<1x64xf32, #tpu.memory_space<vmem>>, vector<1x64xf32>
    %146 = vector.broadcast %145 : vector<1x64xf32> to vector<17x64xf32>
    %147 = arith.addf %144, %146 : vector<17x64xf32>
    %cst_55 = arith.constant 0.000000e+00 : f32
    %148 = vector.broadcast %cst_55 : f32 to vector<17x64xf32>
    %149 = arith.maximumf %147, %148 : vector<17x64xf32>
    %c0_56 = arith.constant 0 : index
    %c0_57 = arith.constant 0 : index
    %150 = vector.load %arg12[%c0_56, %c0_57] : memref<64x32xf32, #tpu.memory_space<vmem>>, vector<64x32xf32>
    %cst_58 = arith.constant dense<0.000000e+00> : vector<17x32xf32>
    %151 = tpu.matmul %149, %150, %cst_58 {dimension_numbers = #tpu.dot_dimension_numbers<[1], [0], [0], [1], [0, 0, 1, 1], [], []>} : vector<17x64xf32>, vector<64x32xf32>, vector<17x32xf32> -> vector<17x32xf32>
    %c0_59 = arith.constant 0 : index
    %c0_60 = arith.constant 0 : index
    %152 = vector.load %arg13[%c0_59, %c0_60] : memref<1x32xf32, #tpu.memory_space<vmem>>, vector<1x32xf32>
    %153 = vector.broadcast %152 : vector<1x32xf32> to vector<17x32xf32>
    %154 = arith.addf %151, %153 : vector<17x32xf32>
    %155 = arith.addf %142, %154 : vector<17x32xf32>
    %c0_61 = arith.constant 0 : index
    %c0_62 = arith.constant 0 : index
    %156 = vector.load %arg14[%c0_61, %c0_62] : memref<1x32xf32, #tpu.memory_space<vmem>>, vector<1x32xf32>
    %c0_63 = arith.constant 0 : index
    %c0_64 = arith.constant 0 : index
    %157 = vector.load %arg15[%c0_63, %c0_64] : memref<1x32xf32, #tpu.memory_space<vmem>>, vector<1x32xf32>
    %cst_65 = arith.constant dense<0.000000e+00> : vector<17xf32>
    %158 = vector.multi_reduction <add>, %155, %cst_65 [1] : vector<17x32xf32> to vector<17xf32>
    %159 = vector.shape_cast %158 : vector<17xf32> to vector<17x1xf32>
    %cst_66 = arith.constant 3.200000e+01 : f32
    %160 = vector.broadcast %cst_66 : f32 to vector<17x1xf32>
    %161 = arith.divf %159, %160 : vector<17x1xf32>
    %162 = vector.broadcast %161 : vector<17x1xf32> to vector<17x32xf32>
    %163 = arith.subf %155, %162 : vector<17x32xf32>
    %164 = arith.mulf %163, %163 : vector<17x32xf32>
    %cst_67 = arith.constant dense<0.000000e+00> : vector<17xf32>
    %165 = vector.multi_reduction <add>, %164, %cst_67 [1] : vector<17x32xf32> to vector<17xf32>
    %166 = vector.shape_cast %165 : vector<17xf32> to vector<17x1xf32>
    %cst_68 = arith.constant 3.200000e+01 : f32
    %167 = vector.broadcast %cst_68 : f32 to vector<17x1xf32>
    %168 = arith.divf %166, %167 : vector<17x1xf32>
    %169 = vector.broadcast %161 : vector<17x1xf32> to vector<17x32xf32>
    %170 = arith.subf %155, %169 : vector<17x32xf32>
    %cst_69 = arith.constant 9.99999974E-6 : f32
    %171 = vector.broadcast %cst_69 : f32 to vector<17x1xf32>
    %172 = arith.addf %168, %171 : vector<17x1xf32>
    %173 = math.rsqrt %172 : vector<17x1xf32>
    %174 = vector.broadcast %173 : vector<17x1xf32> to vector<17x32xf32>
    %175 = arith.mulf %170, %174 : vector<17x32xf32>
    %176 = vector.broadcast %156 : vector<1x32xf32> to vector<17x32xf32>
    %177 = arith.mulf %175, %176 : vector<17x32xf32>
    %178 = vector.broadcast %157 : vector<1x32xf32> to vector<17x32xf32>
    %179 = arith.addf %177, %178 : vector<17x32xf32>
    %180 = vector.shape_cast %179 : vector<17x32xf32> to vector<1x17x32xf32>
    %c0_70 = arith.constant 0 : index
    %c0_71 = arith.constant 0 : index
    %c0_72 = arith.constant 0 : index
    %181 = vector.load %arg16[%c0_70, %c0_71, %c0_72] : memref<1x17x32xf32, #tpu.memory_space<vmem>>, vector<1x17x32xf32>
    tpu.vector_store %arg16[%c0_70, %c0_71, %c0_72], %180 {strides = array<i32>} : memref<1x17x32xf32, #tpu.memory_space<vmem>>, vector<1x17x32xf32>,
    %c0_73 = arith.constant 0 : index
    %c0_74 = arith.constant 0 : index
    %c0_75 = arith.constant 0 : index
    %182 = vector.load %arg2[%c0_73, %c0_74, %c0_75] : memref<1x17x17xf32, #tpu.memory_space<vmem>>, vector<1x17x17xf32>
    %183 = vector.shape_cast %182 : vector<1x17x17xf32> to vector<17x17xf32>
    %184 = arith.addf %183, %108 : vector<17x17xf32>
    %185 = vector.shape_cast %184 : vector<17x17xf32> to vector<1x17x17xf32>
    %c0_76 = arith.constant 0 : index
    %c0_77 = arith.constant 0 : index
    %c0_78 = arith.constant 0 : index
    %186 = vector.load %arg17[%c0_76, %c0_77, %c0_78] : memref<1x17x17xf32, #tpu.memory_space<vmem>>, vector<1x17x17xf32>
    tpu.vector_store %arg17[%c0_76, %c0_77, %c0_78], %185 {strides = array<i32>} : memref<1x17x17xf32, #tpu.memory_space<vmem>>, vector<1x17x17xf32>,
    %c0_79 = arith.constant 0 : index
    %c0_80 = arith.constant 0 : index
    %c0_81 = arith.constant 0 : index
    %187 = vector.load %arg3[%c0_79, %c0_80, %c0_81] : memref<1x17x17xf32, #tpu.memory_space<vmem>>, vector<1x17x17xf32>
    %188 = vector.shape_cast %187 : vector<1x17x17xf32> to vector<17x17xf32>
    %cst_82 = arith.constant dense<0.000000e+00> : vector<17x17xf32>
    %189 = tpu.matmul %111, %188, %cst_82 {dimension_numbers = #tpu.dot_dimension_numbers<[1], [0], [0], [1], [0, 0, 1, 1], [], []>} : vector<17x17xf32>, vector<17x17xf32>, vector<17x17xf32> -> vector<17x17xf32>
    %190 = arith.addf %188, %189 : vector<17x17xf32>
    %cst_83 = arith.constant 0.000000e+00 : f32
    %191 = vector.broadcast %cst_83 : f32 to vector<17x17xf32>
    %192 = arith.cmpf one, %190, %191 : vector<17x17xf32>
    %cst_84 = arith.constant 1.000000e+00 : f32
    %cst_85 = arith.constant 0.000000e+00 : f32
    %193 = vector.broadcast %cst_84 : f32 to vector<17x17xf32>
    %194 = vector.broadcast %cst_85 : f32 to vector<17x17xf32>
    %195 = arith.select %192, %193, %194 : vector<17x17xi1>, vector<17x17xf32>
    %196 = vector.shape_cast %195 : vector<17x17xf32> to vector<1x17x17xf32>
    %c0_86 = arith.constant 0 : index
    %c0_87 = arith.constant 0 : index
    %c0_88 = arith.constant 0 : index
    %197 = vector.load %arg18[%c0_86, %c0_87, %c0_88] : memref<1x17x17xf32, #tpu.memory_space<vmem>>, vector<1x17x17xf32>
    tpu.vector_store %arg18[%c0_86, %c0_87, %c0_88], %196 {strides = array<i32>} : memref<1x17x17xf32, #tpu.memory_space<vmem>>, vector<1x17x17xf32>,
    return
  }
  func.func @transform_0(%arg0: i32) -> (i32, i32, i32) {
    %c0_i32 = arith.constant 0 : i32
    %c0_i32_0 = arith.constant 0 : i32
    %c0_i32_1 = arith.constant 0 : i32
    return %arg0, %c0_i32, %c0_i32_0 : i32, i32, i32
  }
  func.func @transform_1(%arg0: i32) -> (i32, i32, i32) {
    %c0_i32 = arith.constant 0 : i32
    %c0_i32_0 = arith.constant 0 : i32
    %c0_i32_1 = arith.constant 0 : i32
    return %arg0, %c0_i32, %c0_i32_0 : i32, i32, i32
  }
  func.func @transform_2(%arg0: i32) -> (i32, i32, i32) {
    %c0_i32 = arith.constant 0 : i32
    %c0_i32_0 = arith.constant 0 : i32
    %c0_i32_1 = arith.constant 0 : i32
    return %arg0, %c0_i32, %c0_i32_0 : i32, i32, i32
  }
  func.func @transform_3(%arg0: i32) -> (i32, i32) {
    %c0_i32 = arith.constant 0 : i32
    %c0_i32_0 = arith.constant 0 : i32
    %c0_i32_1 = arith.constant 0 : i32
    return %c0_i32, %c0_i32_0 : i32, i32
  }
  func.func @transform_4(%arg0: i32) -> (i32, i32) {
    %c0_i32 = arith.constant 0 : i32
    %c0_i32_0 = arith.constant 0 : i32
    %c0_i32_1 = arith.constant 0 : i32
    return %c0_i32, %c0_i32_0 : i32, i32
  }
  func.func @transform_5(%arg0: i32) -> (i32, i32) {
    %c0_i32 = arith.constant 0 : i32
    %c0_i32_0 = arith.constant 0 : i32
    %c0_i32_1 = arith.constant 0 : i32
    return %c0_i32, %c0_i32_0 : i32, i32
  }
  func.func @transform_6(%arg0: i32) -> (i32, i32) {
    %c0_i32 = arith.constant 0 : i32
    %c0_i32_0 = arith.constant 0 : i32
    %c0_i32_1 = arith.constant 0 : i32
    return %c0_i32, %c0_i32_0 : i32, i32
  }
  func.func @transform_7(%arg0: i32) -> (i32, i32) {
    %c0_i32 = arith.constant 0 : i32
    %c0_i32_0 = arith.constant 0 : i32
    %c0_i32_1 = arith.constant 0 : i32
    return %c0_i32, %c0_i32_0 : i32, i32
  }
  func.func @transform_8(%arg0: i32) -> (i32, i32) {
    %c0_i32 = arith.constant 0 : i32
    %c0_i32_0 = arith.constant 0 : i32
    %c0_i32_1 = arith.constant 0 : i32
    return %c0_i32, %c0_i32_0 : i32, i32
  }
  func.func @transform_9(%arg0: i32) -> (i32, i32) {
    %c0_i32 = arith.constant 0 : i32
    %c0_i32_0 = arith.constant 0 : i32
    %c0_i32_1 = arith.constant 0 : i32
    return %c0_i32, %c0_i32_0 : i32, i32
  }
  func.func @transform_10(%arg0: i32) -> (i32, i32) {
    %c0_i32 = arith.constant 0 : i32
    %c0_i32_0 = arith.constant 0 : i32
    %c0_i32_1 = arith.constant 0 : i32
    return %c0_i32, %c0_i32_0 : i32, i32
  }
  func.func @transform_11(%arg0: i32) -> (i32, i32) {
    %c0_i32 = arith.constant 0 : i32
    %c0_i32_0 = arith.constant 0 : i32
    %c0_i32_1 = arith.constant 0 : i32
    return %c0_i32, %c0_i32_0 : i32, i32
  }
  func.func @transform_12(%arg0: i32) -> (i32, i32) {
    %c0_i32 = arith.constant 0 : i32
    %c0_i32_0 = arith.constant 0 : i32
    %c0_i32_1 = arith.constant 0 : i32
    return %c0_i32, %c0_i32_0 : i32, i32
  }
  func.func @transform_13(%arg0: i32) -> (i32, i32) {
    %c0_i32 = arith.constant 0 : i32
    %c0_i32_0 = arith.constant 0 : i32
    %c0_i32_1 = arith.constant 0 : i32
    return %c0_i32, %c0_i32_0 : i32, i32
  }
  func.func @transform_14(%arg0: i32) -> (i32, i32) {
    %c0_i32 = arith.constant 0 : i32
    %c0_i32_0 = arith.constant 0 : i32
    %c0_i32_1 = arith.constant 0 : i32
    return %c0_i32, %c0_i32_0 : i32, i32
  }
  func.func @transform_15(%arg0: i32) -> (i32, i32, i32) {
    %c0_i32 = arith.constant 0 : i32
    %c0_i32_0 = arith.constant 0 : i32
    %c0_i32_1 = arith.constant 0 : i32
    return %arg0, %c0_i32, %c0_i32_0 : i32, i32, i32
  }
  func.func @transform_16(%arg0: i32) -> (i32, i32, i32) {
    %c0_i32 = arith.constant 0 : i32
    %c0_i32_0 = arith.constant 0 : i32
    %c0_i32_1 = arith.constant 0 : i32
    return %arg0, %c0_i32, %c0_i32_0 : i32, i32, i32
  }
  func.func @transform_17(%arg0: i32) -> (i32, i32, i32) {
    %c0_i32 = arith.constant 0 : i32
    %c0_i32_0 = arith.constant 0 : i32
    %c0_i32_1 = arith.constant 0 : i32
    return %arg0, %c0_i32, %c0_i32_0 : i32, i32, i32
  }
}

module attributes {stable_mosaic.version = 11 : i64} {
  func.func @_head_kernel(%arg0: memref<2x17x32xf32, #tpu.memory_space<vmem>>, %arg1: memref<32x3xf32, #tpu.memory_space<vmem>>, %arg2: memref<1x3xf32, #tpu.memory_space<vmem>>, %arg3: memref<2x16x2xf32, #tpu.memory_space<vmem>>, %arg4: memref<2x1xf32, #tpu.memory_space<vmem>>) attributes {dimension_semantics = [], scalar_prefetch = 0 : i64, scratch_operands = 0 : i64, tpu.core_type = #tpu.core_type<tc>} {
    %c0 = arith.constant 0 : index
    %c0_0 = arith.constant 0 : index
    %c0_1 = arith.constant 0 : index
    %0 = vector.load %arg0[%c0, %c0_0, %c0_1] : memref<2x17x32xf32, #tpu.memory_space<vmem>>, vector<1x17x32xf32>
    %1 = vector.shape_cast %0 : vector<1x17x32xf32> to vector<17x32xf32>
    %c0_2 = arith.constant 0 : index
    %c0_3 = arith.constant 0 : index
    %2 = vector.load %arg1[%c0_2, %c0_3] : memref<32x3xf32, #tpu.memory_space<vmem>>, vector<32x3xf32>
    %cst = arith.constant dense<0.000000e+00> : vector<17x3xf32>
    %3 = tpu.matmul %1, %2, %cst {dimension_numbers = #tpu.dot_dimension_numbers<[1], [0], [0], [1], [0, 0, 1, 1], [], []>} : vector<17x32xf32>, vector<32x3xf32>, vector<17x3xf32> -> vector<17x3xf32>
    %c0_4 = arith.constant 0 : index
    %c0_5 = arith.constant 0 : index
    %4 = vector.load %arg2[%c0_4, %c0_5] : memref<1x3xf32, #tpu.memory_space<vmem>>, vector<1x3xf32>
    %5 = vector.broadcast %4 : vector<1x3xf32> to vector<17x3xf32>
    %6 = arith.addf %3, %5 : vector<17x3xf32>
    %7 = vector.extract_strided_slice %6 {offsets = [0, 0], sizes = [16, 2], strides = [1, 1]} : vector<17x3xf32> to vector<16x2xf32>
    %c0_6 = arith.constant 0 : index
    %c0_7 = arith.constant 0 : index
    %c0_8 = arith.constant 0 : index
    %8 = vector.load %arg3[%c0_6, %c0_7, %c0_8] : memref<2x16x2xf32, #tpu.memory_space<vmem>>, vector<1x16x2xf32>
    %9 = vector.shape_cast %8 : vector<1x16x2xf32> to vector<16x2xf32>
    %10 = vector.shape_cast %7 : vector<16x2xf32> to vector<1x16x2xf32>
    tpu.vector_store %arg3[%c0_6, %c0_7, %c0_8], %10 {strides = array<i32>} : memref<2x16x2xf32, #tpu.memory_space<vmem>>, vector<1x16x2xf32>,
    %11 = vector.extract_strided_slice %6 {offsets = [16, 2], sizes = [1, 1], strides = [1, 1]} : vector<17x3xf32> to vector<1x1xf32>
    %c0_9 = arith.constant 0 : index
    %c0_10 = arith.constant 0 : index
    %12 = vector.load %arg4[%c0_9, %c0_10] : memref<2x1xf32, #tpu.memory_space<vmem>>, vector<1x1xf32>
    tpu.vector_store %arg4[%c0_9, %c0_10], %11 {strides = array<i32>} : memref<2x1xf32, #tpu.memory_space<vmem>>, vector<1x1xf32>,
    %c1 = arith.constant 1 : index
    %c0_11 = arith.constant 0 : index
    %c0_12 = arith.constant 0 : index
    %13 = vector.load %arg0[%c1, %c0_11, %c0_12] : memref<2x17x32xf32, #tpu.memory_space<vmem>>, vector<1x17x32xf32>
    %14 = vector.shape_cast %13 : vector<1x17x32xf32> to vector<17x32xf32>
    %c0_13 = arith.constant 0 : index
    %c0_14 = arith.constant 0 : index
    %15 = vector.load %arg1[%c0_13, %c0_14] : memref<32x3xf32, #tpu.memory_space<vmem>>, vector<32x3xf32>
    %cst_15 = arith.constant dense<0.000000e+00> : vector<17x3xf32>
    %16 = tpu.matmul %14, %15, %cst_15 {dimension_numbers = #tpu.dot_dimension_numbers<[1], [0], [0], [1], [0, 0, 1, 1], [], []>} : vector<17x32xf32>, vector<32x3xf32>, vector<17x3xf32> -> vector<17x3xf32>
    %c0_16 = arith.constant 0 : index
    %c0_17 = arith.constant 0 : index
    %17 = vector.load %arg2[%c0_16, %c0_17] : memref<1x3xf32, #tpu.memory_space<vmem>>, vector<1x3xf32>
    %18 = vector.broadcast %17 : vector<1x3xf32> to vector<17x3xf32>
    %19 = arith.addf %16, %18 : vector<17x3xf32>
    %20 = vector.extract_strided_slice %19 {offsets = [0, 0], sizes = [16, 2], strides = [1, 1]} : vector<17x3xf32> to vector<16x2xf32>
    %c1_18 = arith.constant 1 : index
    %c0_19 = arith.constant 0 : index
    %c0_20 = arith.constant 0 : index
    %21 = vector.load %arg3[%c1_18, %c0_19, %c0_20] : memref<2x16x2xf32, #tpu.memory_space<vmem>>, vector<1x16x2xf32>
    %22 = vector.shape_cast %21 : vector<1x16x2xf32> to vector<16x2xf32>
    %23 = vector.shape_cast %20 : vector<16x2xf32> to vector<1x16x2xf32>
    tpu.vector_store %arg3[%c1_18, %c0_19, %c0_20], %23 {strides = array<i32>} : memref<2x16x2xf32, #tpu.memory_space<vmem>>, vector<1x16x2xf32>,
    %24 = vector.extract_strided_slice %19 {offsets = [16, 2], sizes = [1, 1], strides = [1, 1]} : vector<17x3xf32> to vector<1x1xf32>
    %c1_21 = arith.constant 1 : index
    %c0_22 = arith.constant 0 : index
    %25 = vector.load %arg4[%c1_21, %c0_22] : memref<2x1xf32, #tpu.memory_space<vmem>>, vector<1x1xf32>
    tpu.vector_store %arg4[%c1_21, %c0_22], %24 {strides = array<i32>} : memref<2x1xf32, #tpu.memory_space<vmem>>, vector<1x1xf32>,
    return
  }
}

</mosaic_0001>

<bundles_post_ra>
// kernel: _lambda_.4
= control target key start
LH: loop header
LB: loop body
LE: loop exit
PB: predicated region body
PF: predicated region fallthrough
CT: control target
= control target key end

     0   :  { %vm39_vm0 = vcmask 1044480   ;;  %vm35_vm1 = vcmask 39936   ;;  %v359_v0 = vmov 0.0   ;;  %vm360_vm2 = vmmov 0   ;;  %s458_s3 = inlined_call_operand.vmem [shape: f32[5,32], index: 3, kind: input, shape index: {}]   ;;  %s459_s1 = inlined_call_operand.vmem [shape: f32[2,5], index: 1, kind: input, shape index: {}]   ;;  %s460_s2 = inlined_call_operand.vmem [shape: f32[3,32], index: 2, kind: input, shape index: {}]   ;;  %s461_s0 = inlined_call_operand.vmem [shape: f32[2,16,3], index: 0, kind: input, shape index: {}]   ;;  %s462_s5 = inlined_call_operand.vmem [shape: f32[1,32], index: 5, kind: input, shape index: {}]   ;;  %s463_s6 = inlined_call_operand.vmem [shape: f32[17,32], index: 6, kind: input, shape index: {}]   ;;  %s464_s7 = inlined_call_operand.vmem [shape: f32[2,17,32], index: 7, kind: output, shape index: {}]   ;;  %s465_s4 = inlined_call_operand.vmem [shape: f32[1,32], index: 4, kind: input, shape index: {}]  }
   0x1   :  { %342 = vmatprep.subr.mxu0 %v359_v0  ;;  %v27_v1 = vld [vmem:[%s458_s3] sm:$0x1f]  ;;  %344 = vmatprep.mubr.msk.f32.mxu0 %vm360_vm2, %v359_v0  ;;  %vm132_vm3 = vcmask 1042432   ;;  %vm125_vm4 = vcmask 23552   ;;  %v326_v6 = vld [vmem:[%s461_s0 + $0x10] sm:$0xff]  ;;  %v119_v7 = vld [vmem:[%s461_s0 + $0x8] sm:$0xff]  ;;  %v121_v12 = vlaneseq }
   0x2   :  { %v26_v2 = vld [vmem:[%s459_s1] sm:$0x3]  ;;  %343 = vmatpush3.msk.msra.mxu0 %vm39_vm0, %v27_v1  ;;  %v327_v8 = vld [vmem:[%s461_s0 + $0x18] sm:$0xff]  ;;  %v114_v10 = vld [vmem:[%s463_s6 + $0x10] sm:$0x1]  ;;  %vm216_vm5 = vcmask 253952  }
   0x3   :  { %v221_v3 = vld [vmem:[%s460_s2] sm:$0x7]  ;;  %345 = vmatmul.mubr.msk.f32.vlgmr.msra.gmra.mrb[0].mxu0 %vm35_vm1, %v26_v2  ;;  %v122_v13 = vshrl.u32 %v121_v12, 7  ;;  %v117_v23 = vld [vmem:[%s463_s6 + $0x8] sm:$0xff]  ;;  %vm213_vm6 = vcmask 261120  }
   0x4   :  { %v120_v4 = vld [vmem:[%s460_s2] sm:$0x7]  ;;  %352 = vmatprep.subr.msk.mxu0 %vm132_vm3, %v221_v3  ;;  %354 = vmatprep.mubr.msk.f32.mxu0 %vm125_vm4, %v326_v6 }
   0x5   :  { %v118_v5 = vld [vmem:[%s461_s0] sm:$0xff]  ;;  %353 = vmatpush3.msk.msra.mxu0 %vm132_vm3, %v221_v3  ;;  %347 = vmatprep.subr.msk.mxu1 %vm132_vm3, %v120_v4  ;;  %v123_v15 = vsub.s32 0, %v122_v13  ;;  %v224_v16 = vsub.s32 1, %v122_v13 }
   0x6   :  { %348 = vmatpush3.msk.msra.mxu1 %vm132_vm3, %v120_v4  ;;  %349 = vmatprep.mubr.msk.f32.mxu1 %vm125_vm4, %v118_v5  ;;  %v113_v9 = vld [vmem:[%s462_s5] sm:$0x1] }
   0x7   :  { %350 = vmatmul.mubr.msk.f32.vlgmr.msra.gmra.mrb[0].mxu1 %vm125_vm4, %v119_v7  ;;  %355 = vmatmul.mubr.msk.f32.vlgmr.msra.gmra.mrb[2].mxu0 %vm125_vm4, %v327_v8  ;;  %v115_v11 = vadd.f32 %v114_v10, %v113_v9  ;;  %v320_v14 = vld [vmem:[%s465_s4] ss:$0 sm:$0xff] }
   0x8   :  { %v116_v25 = vld [vmem:[%s463_s6] sm:$0xff] }
   0x9   :  { %217 = vst.msk [vmem:[%s464_s7 + $0x10] sm:$0x1] %vm216_vm5, %v115_v11  ;;  %333 = vst.msk [vmem:[%s464_s7 + $0x28] sm:$0x1] %vm216_vm5, %v115_v11 }
  0xd6   :  { %v109_v17 = vpop.f32.mrb[0].mxu0 }
  0xd7   :  { %v110_v18 = vadd.f32 %v320_v14, %v109_v17  ;;  %v346_v19 = vpop.f32.mrb[1].mxu0 }
  0xd9   :  { %v124_v20 = vrot.slane %v110_v18, %v123_v15  ;;  %v225_v22 = vrot.slane %v110_v18, %v224_v16 }
  0xda   :  { %v351_v21 = vpop.f32.mrb[0].mxu1  ;;  %v356_v24 = vpop.f32.mrb[2].mxu0 }
  0xdb   :  { %v202_v26 = vpop.f32.mrb[1].mxu1  ;;  %v208_v27 = vadd.f32 %v351_v21, %v124_v20  ;;  %v307_v28 = vadd.f32 %v356_v24, %v225_v22  ;;  %v301_v30 = vpop.f32.mrb[3].mxu0 }
  0xdc   :  { %v203_v29 = vadd.f32 %v202_v26, %v124_v20  ;;  %v302_v31 = vadd.f32 %v301_v30, %v225_v22 }
  0xdd   :  { %v212_v32 = vadd.f32 %v208_v27, %v117_v23  ;;  %v311_v33 = vadd.f32 %v307_v28, %v117_v23 }
  0xde   :  { %v211_v34 = vadd.f32 %v203_v29, %v116_v25  ;;  %v310_v35 = vadd.f32 %v302_v31, %v116_v25 }
  0xdf   :  { %215 = vst.msk [vmem:[%s464_s7 + $0x8] sm:$0xff] %vm213_vm6, %v212_v32  ;;  %332 = vst.msk [vmem:[%s464_s7 + $0x20] sm:$0xff] %vm213_vm6, %v311_v33 }
  0xe0   :  { %214 = vst.msk [vmem:[%s464_s7] sm:$0xff] %vm213_vm6, %v211_v34  ;;  %331 = vst.msk [vmem:[%s464_s7 + $0x18] sm:$0xff] %vm213_vm6, %v310_v35 }

// kernel: _lambda_.7
= control target key start
LH: loop header
LB: loop body
LE: loop exit
PB: predicated region body
PF: predicated region fallthrough
CT: control target
= control target key end

     0   :  { %v326_v0 = vmov 0.0|0.0   ;;  %vm327_vm0 = vmmov 0   ;;  %v328_v6 = vmov 0.0   ;;  %vm30_vm1 = vcmask 261120   ;;  %s329_s16 = smov 126   ;;  %s418_s1 = inlined_call_operand.vmem [shape: f32[32,3], index: 1, kind: input, shape index: {}]   ;;  %s419_s0 = inlined_call_operand.vmem [shape: f32[2,17,32], index: 0, kind: input, shape index: {}]   ;;  %s420_s2 = inlined_call_operand.vmem [shape: f32[1,3], index: 2, kind: input, shape index: {}]   ;;  %s421_s3 = inlined_call_operand.vmem [shape: f32[2,16,2], index: 3, kind: output, shape index: {0}]   ;;  %s422_s4 = inlined_call_operand.vmem [shape: f32[2,1], index: 4, kind: output, shape index: {1}]  }
   0x1   :  { %310 = vmatprep.subr.bf16.mxu0 %v326_v0  ;;  %v19_v1 = vld [vmem:[%s418_s1] sm:$0xff]  ;;  %v20_v2 = vld [vmem:[%s418_s1 + $0x8] sm:$0xff]  ;;  %316 = vmatprep.subr.bf16.mxu1 %v326_v0  ;;  %v21_v3 = vld [vmem:[%s418_s1 + $0x10] sm:$0xff]  ;;  %vm120_vm2 = vcmask 15360   ;;  %vm127_vm3 = vcmask 0  }
   0x2   :  { %v311_v4 = vpack.c.bf16 %v20_v2, %v19_v1  ;;  %v22_v5 = vld [vmem:[%s418_s1 + $0x18] sm:$0xff]  ;;  %284 = vmatprep.mubr.msk.f32.mxu0 %vm327_vm0, %v328_v6  ;;  %301 = vmatprep.mubr.msk.f32.mxu1 %vm327_vm0, %v328_v6  ;;  %v16_v8 = vld [vmem:[%s419_s0] sm:$0xff]  ;;  %v17_v10 = vld [vmem:[%s419_s0 + $0x8] sm:$0xff] }
   0x3   :  { %v314_v7 = vpack.c.bf16 %v22_v5, %v21_v3  ;;  %v253_v9 = vld [vmem:[%s419_s0 + $0x18] sm:$0xff]  ;;  %v254_v11 = vld [vmem:[%s419_s0 + $0x20] sm:$0xff]  ;;  %v18_v12 = vld [vmem:[%s419_s0 + $0x10] sm:$0x1] }
   0x4   :  { %312 = vmatpush3.bf16.msra.mxu0 %v311_v4  ;;  %318 = vmatpush3.bf16.msra.mxu1 %v311_v4  ;;  %v255_v13 = vld [vmem:[%s419_s0 + $0x28] sm:$0x1]  ;;  %v249_v14 = vld [vmem:[%s420_s2] ss:$0 sm:$0xff] }
   0x5   :  { %313 = vmatprep.subr.bf16.mxu0 %v326_v0  ;;  %319 = vmatprep.subr.bf16.mxu1 %v326_v0 }
   0x8   :  { %315 = vmatpush3.bf16.msra.mxu0 %v314_v7  ;;  %321 = vmatpush3.bf16.msra.mxu1 %v314_v7 }
   0xb   :  { %285 = vmatmul.mubr.msk.f32.vlgmr.msra.gmra.mrb[0].mxu0 %vm30_vm1, %v16_v8  ;;  %302 = vmatmul.mubr.msk.f32.vlgmr.msra.gmra.mrb[0].mxu1 %vm30_vm1, %v253_v9 }
   0xc   :  { %287 = vmatprep.mubr.msk.f32.mxu0 %vm327_vm0, %v328_v6  ;;  %304 = vmatprep.mubr.msk.f32.mxu1 %vm327_vm0, %v328_v6 }
   0xf   :  { %288 = vmatmul.mubr.msk.f32.gmra.mrb[2].mxu0 %vm30_vm1, %v17_v10  ;;  %305 = vmatmul.mubr.msk.f32.gmra.mrb[2].mxu1 %vm30_vm1, %v254_v11 }
  0x10   :  { %290 = vmatprep.mubr.msk.f32.mxu0 %vm327_vm0, %v328_v6  ;;  %307 = vmatprep.mubr.msk.f32.mxu1 %vm327_vm0, %v328_v6 }
  0x13   :  { %291 = vmatmul.mubr.msk.f32.gmra.mrb[4].mxu0 %vm30_vm1, %v18_v12  ;;  %308 = vmatmul.mubr.msk.f32.gmra.mrb[4].mxu1 %vm30_vm1, %v255_v13 }
  0xde   :  { %v106_v15 = vpop.f32.mrb[0].mxu0  ;;  %v219_v16 = vpop.f32.mrb[0].mxu1 }
  0xdf   :  { %v107_v17 = vadd.f32 %v249_v14, %v106_v15  ;;  %v286_v18 = vpop.f32.mrb[1].mxu0  ;;  %v220_v19 = vadd.f32 %v249_v14, %v219_v16  ;;  %v303_v20 = vpop.f32.mrb[1].mxu1 }
  0xe1   :  { %121 = vst.msk [vmem:[%s421_s3] sm:$0xff] %vm120_vm2, %v107_v17  ;;  %260 = vst.msk [vmem:[%s421_s3 + $0x10] sm:$0xff] %vm120_vm2, %v220_v19 }
  0xe2   :  { %v111_v21 = vpop.f32.mrb[2].mxu0  ;;  %v224_v22 = vpop.f32.mrb[2].mxu1 }
  0xe3   :  { %v112_v23 = vadd.f32 %v249_v14, %v111_v21  ;;  %v289_v24 = vpop.f32.mrb[3].mxu0  ;;  %v225_v25 = vadd.f32 %v249_v14, %v224_v22  ;;  %v306_v26 = vpop.f32.mrb[3].mxu1 }
  0xe5   :  { %122 = vst.msk [vmem:[%s421_s3 + $0x8] sm:$0xff] %vm120_vm2, %v112_v23  ;;  %261 = vst.msk [vmem:[%s421_s3 + $0x18] sm:$0xff] %vm120_vm2, %v225_v25 }
  0xe6   :  { %v116_v27 = vpop.f32.mrb[4].mxu0  ;;  %v229_v28 = vpop.f32.mrb[4].mxu1 }
  0xe7   :  { %v117_v29 = vadd.f32 %v249_v14, %v116_v27  ;;  %v292_v30 = vpop.f32.mrb[5].mxu0  ;;  %v309_v31 = vpop.f32.mrb[5].mxu1  ;;  %v230_v32 = vadd.f32 %v249_v14, %v229_v28 }
  0xe9   :  { %124 = vrot.lane.b32.xlu0 %v117_v29, %s329_s16 }
  0xed   :  { %237 = vrot.lane.b32.xlu0 %v230_v32, %s329_s16 }
 0x15b   :  { %v125_v33 = vpop.permute.xlu0 %124 }
 0x15c   :  { %128 = vst.msk [vmem:[%s422_s4] sm:$0x1] %vm127_vm3, %v125_v33 }
 0x15f   :  { %v238_v34 = vpop.permute.xlu0 %237 }
 0x160   :  { %240 = vst.msk [vmem:[%s422_s4 + $0x1] sm:$0x1] %vm127_vm3, %v238_v34 }

// kernel: _lambda_.5
= control target key start
LH: loop header
LB: loop body
LE: loop exit
PB: predicated region body
PF: predicated region fallthrough
CT: control target
= control target key end

     0   :  { %s3183_s24 = smov 0   ;;  %s3741_s0 = inlined_call_operand.vmem [shape: f32[2,17,32], index: 0, kind: input, shape index: {}]   ;;  %s3742_s1 = inlined_call_operand.vmem [shape: f32[2,17,17], index: 1, kind: input, shape index: {}]   ;;  %s3743_s2 = inlined_call_operand.vmem [shape: f32[2,17,17], index: 2, kind: input, shape index: {}]   ;;  %s3744_s3 = inlined_call_operand.vmem [shape: f32[32,96], index: 3, kind: input, shape index: {}]   ;;  %s3745_s4 = inlined_call_operand.vmem [shape: f32[1,96], index: 4, kind: input, shape index: {}]   ;;  %s3746_s5 = inlined_call_operand.vmem [shape: f32[32,32], index: 5, kind: input, shape index: {}]   ;;  %s3747_s6 = inlined_call_operand.vmem [shape: f32[1,32], index: 6, kind: input, shape index: {}]   ;;  %s3748_s7 = inlined_call_operand.vmem [shape: f32[1,32], index: 7, kind: input, shape index: {}]   ;;  %s3749_s8 = inlined_call_operand.vmem [shape: f32[1,32], index: 8, kind: input, shape index: {}]   ;;  %s3750_s9 = inlined_call_operand.vmem [shape: f32[32,64], index: 9, kind: input, shape index: {}]   ;;  %s3751_s10 = inlined_call_operand.vmem [shape: f32[1,64], index: 10, kind: input, shape index: {}]   ;;  %s3752_s11 = inlined_call_operand.vmem [shape: f32[64,32], index: 11, kind: input, shape index: {}]   ;;  %s3753_s12 = inlined_call_operand.vmem [shape: f32[1,32], index: 12, kind: input, shape index: {}]   ;;  %s3754_s13 = inlined_call_operand.vmem [shape: f32[1,32], index: 13, kind: input, shape index: {}]   ;;  %s3755_s14 = inlined_call_operand.vmem [shape: f32[1,32], index: 14, kind: input, shape index: {}]   ;;  %s3756_s15 = inlined_call_operand.vmem [shape: f32[2,17,32], index: 15, kind: output, shape index: {0}]   ;;  %s3757_s16 = inlined_call_operand.vmem [shape: f32[2,17,17], index: 16, kind: output, shape index: {1}]   ;;  %s3758_s17 = inlined_call_operand.vmem [shape: f32[2,17,17], index: 17, kind: output, shape index: {2}]  }
   0x1   :  { %3759 = sst [smem:[#allocation2_spill]] %s3741_s0 }
   0x2   :  { %3760 = sst [smem:[#allocation3_spill]] %s3742_s1 }
   0x3 LB: > { %s2492_s25 = sadd.s32 4294967295, %s3074_s24   ;;  %p2496_p0 = scmp.ge.s32.totalorder %s3074_s24, 1  ;;  %s3074_s24 = sphi %s3183_s24, %s28_s24  }
   0x4   : > { %p512_p1 = scmp.lt.s32.totalorder %s3074_s24, 3 }
   0x6   : > { %p513_p2 = pnand %p2496_p0, %p512_p1 }
   0x7   : > { %v617_v0 = vld [vmem:[%s3744_s3] sm:$0xff] (!%p513_p2)  ;;  %v618_v1 = vld [vmem:[%s3744_s3 + $0x8] sm:$0xff] (!%p513_p2)  ;;  %v619_v2 = vld [vmem:[%s3744_s3 + $0x10] sm:$0xff] (!%p513_p2)  ;;  %v3076_v3 = vmov (!%p513_p2), 0.0|0.0   ;;  %vm3077_vm0 = vmmov (!%p513_p2), 0   ;;  %v3078_v6 = vmov (!%p513_p2), 0.0  }
   0x8   : > { %516 = sbr.rel (%p513_p2) target bundleno = 2589 (0xa1d), region = 80  ;;  %2878 = vmatprep.subr.bf16.mxu0 (!%p513_p2), %v3076_v3  ;;  %v2879_v4 = vpack.c.bf16 (!%p513_p2), %v618_v1, %v617_v0  ;;  %v620_v5 = vld [vmem:[%s3744_s3 + $0x18] sm:$0xff] (!%p513_p2)  ;;  %2675 = vmatprep.mubr.msk.f32.mxu0 (!%p513_p2), %vm3077_vm0, %v3078_v6  ;;  %p584_p3 = scmp.lt.s32.totalorder (!%p513_p2), %s2492_s25, 1  ;;  %vm628_vm1 = vcmask (!%p513_p2), 261120   ;;  %v2503_v13 = vld [vmem:[%s3745_s4] ss:$0 sm:$0xff] (!%p513_p2) }
   0x9   : > { %2884 = vmatprep.subr.bf16.mxu1 (!%p513_p2), %v3076_v3  ;;  %2690 = vmatprep.mubr.msk.f32.mxu1 (!%p513_p2), %vm3077_vm0, %v3078_v6  ;;  %v2882_v7 = vpack.c.bf16 (!%p513_p2), %v620_v5, %v619_v2  ;;  %s3761_s22 = sld [smem:[#allocation2_spill]] (!%p513_p2)  ;;  %s3079_s27 = smov (!%p513_p2), 88   ;;  %vm727_vm2 = vcmask (!%p513_p2), 64512   ;;  %vm823_vm4 = vcmask (!%p513_p2), 138240   ;;  %vm830_vm5 = vcmask (!%p513_p2), 131072  }
   0xa   : > { %2880 = vmatpush3.bf16.msra.mxu0 (!%p513_p2), %v2879_v4  ;;  %s3080_s28 = smov (!%p513_p2), 96   ;;  %s3081_s29 = smov (!%p513_p2), 120   ;;  %vm3253_vm3 = vmpackc.low (!%p513_p2), %vm727_vm2, %vm727_vm2  ;;  %vm881_vm6 = vcmask (!%p513_p2), 1040384  }
   0xb   : > { %2881 = vmatprep.subr.bf16.mxu0 (!%p513_p2), %v3076_v3  ;;  %s3082_s0 = smov (!%p513_p2), 80   ;;  %s3083_s30 = smov (!%p513_p2), 72  }
   0xc   : > { %s3084_s18 = smov (!%p513_p2), 112   ;;  %s3085_s19 = smov (!%p513_p2), 104  }
   0xd   : > { %s3086_s20 = smov (!%p513_p2), 64   ;;  %s3087_s21 = smov (!%p513_p2), 56  }
   0xe   : > { %2883 = vmatpush3.bf16.msra.mxu0 (!%p513_p2), %v2882_v7 }
   0xf   : > { %s3766_s25 = smov (!%p584_p3, %s2492_s25), 1  ;;  %2888 = vmatprep.subr.bf16.mxu0 %v3076_v3 }
  0x10   : > { %s3210_s1 = smul.u32 24, %s3766_s25  ;;  %s3089_s25 = smov 40  }
  0x12   : > { %s3216_s23 = scalar_lea.vmem %s3761_s22, %s3210_s1  ;;  %s3088_s22 = smov 48  }
  0x13   : > { %v614_v8 = vld [vmem:[%s3216_s23] sm:$0xff]  ;;  %v615_v9 = vld [vmem:[%s3216_s23 + $0x8] sm:$0xff]  ;;  %v616_v10 = vld [vmem:[%s3216_s23 + $0x10] sm:$0x1]  ;;  %s603_s26 = scalar_lea.vmem %s3756_s15, %s3210_s1 }
  0x14   : > { %2676 = vmatmul.mubr.msk.f32.vlgmr.msra.gmra.mrb[0].mxu0 %vm628_vm1, %v614_v8 }
  0x15   : > { %2678 = vmatprep.mubr.msk.f32.mxu0 %vm3077_vm0, %v3078_v6 }
  0x18   : > { %2679 = vmatmul.mubr.msk.f32.gmra.mrb[2].mxu0 %vm628_vm1, %v615_v9 }
  0x19   : > { %2681 = vmatprep.mubr.msk.f32.mxu0 %vm3077_vm0, %v3078_v6 }
  0x1c   : > { %2682 = vmatmul.mubr.msk.f32.gmra.mrb[4].mxu0 %vm628_vm1, %v616_v10 }
  0x1d   : > { %2705 = vmatprep.mubr.msk.f32.mxu0 %vm3077_vm0, %v3078_v6 }
  0xe7   : > { %v704_v11 = vpop.f32.mrb[0].mxu0 }
  0xe8   : > { %v2677_v12 = vpop.f32.mrb[1].mxu0  ;;  %v705_v15 = vadd.f32 %v2503_v13, %v704_v11 }
  0xeb   : > { %v709_v14 = vpop.f32.mrb[2].mxu0 }
  0xec   : > { %v710_v16 = vadd.f32 %v2503_v13, %v709_v14  ;;  %v2680_v17 = vpop.f32.mrb[3].mxu0 }
  0xee   : > { %v3234_v18 = vpack.i.bf16 %v710_v16, %v705_v15 }
  0xef   : > { %v714_v19 = vpop.f32.mrb[4].mxu0 }
  0xf0   : > { %2971 = vrot.lane.b32.xlu1 %v3234_v18, %s3079_s27  ;;  %2966 = vrot.lane.b32.xlu0 %v3234_v18, %s3080_s28  ;;  %v3238_v20 = vadd.f32 %v2503_v13, %v714_v19  ;;  %v2683_v21 = vpop.f32.mrb[5].mxu0 }
  0xf4   : > { %986 = vrot.lane.b32.xlu1 %v3238_v20, %s3079_s27  ;;  %725 = vrot.lane.b32.xlu0 %v3238_v20, %s3080_s28  ;;  %s3764_s28 = sld [smem:[#allocation3_spill]] }
  0xf8   : > { %976 = vrot.lane.b32.xlu1 %v705_v15, %s3081_s29  ;;  %2976 = vrot.lane.b32.xlu0 %v3234_v18, %s3082_s0 }
  0xfc   : > { %980 = vrot.lane.b32.xlu1 %v3238_v20, %s3081_s29  ;;  %978 = vrot.lane.b32.xlu0 %v710_v16, %s3081_s29  ;;  %s3507_s29 = scalar_lea.vmem %s3764_s28, %s3210_s1 }
 0x100   : > { %2981 = vrot.lane.b32.xlu1 %v3234_v18, %s3083_s30  ;;  %1243 = vrot.lane.b32.xlu0 %v3238_v20, %s3082_s0  ;;  %s3091_s0 = smov 16  }
 0x104   : > { %1235 = vrot.lane.b32.xlu1 %v710_v16, %s3084_s18  ;;  %1233 = vrot.lane.b32.xlu0 %v705_v15, %s3084_s18 }
 0x108   : > { %1500 = vrot.lane.b32.xlu1 %v3238_v20, %s3083_s30  ;;  %1237 = vrot.lane.b32.xlu0 %v3238_v20, %s3084_s18  ;;  %s608_s18 = scalar_lea.vmem %s3757_s16, %s3210_s1  ;;  %s3092_s30 = smov 24  }
 0x10c   : > { %1492 = vrot.lane.b32.xlu1 %v710_v16, %s3085_s19  ;;  %1490 = vrot.lane.b32.xlu0 %v705_v15, %s3085_s19 }
 0x110   : > { %1494 = vrot.lane.b32.xlu0 %v3238_v20, %s3085_s19  ;;  %s3090_s19 = smov 8  }
 0x114   : > { %2986 = vrot.lane.b32.xlu0 %v3234_v18, %s3086_s20 }
 0x162   : > { %v2967_v22 = vpop.permute.xlu0 %2966  ;;  %v2972_v28 = vpop.permute.xlu1 %2971 }
 0x163   : > { %v2969_v23 = vunpack.i.h.bf16 %v2967_v22  ;;  %v2968_v24 = vunpack.i.l.bf16 %v2967_v22  ;;  %v2974_v30 = vunpack.i.h.bf16 %v2972_v28  ;;  %v2973_v31 = vunpack.i.l.bf16 %v2972_v28 }
 0x165   : > { %v2885_v26 = vpack.c.bf16 %v2969_v23, %v2968_v24  ;;  %v2892_v34 = vpack.c.bf16 %v2974_v30, %v2973_v31 }
 0x166   : > { %v726_v27 = vpop.permute.xlu0 %725  ;;  %v987_v33 = vpop.permute.xlu1 %986 }
 0x167   : > { %2887 = vmatpush3.bf16.xpose.msk.msra.mxu1 %vm3253_vm3, %v2885_v26 }
 0x168   : > { %2688 = vmatprep.subr.mxu1 %v3078_v6 }
 0x16a   : > { %v2977_v29 = vpop.permute.xlu0 %2976  ;;  %v977_v36 = vpop.permute.xlu1 %976 }
 0x16b   : > { %v2979_v38 = vunpack.i.h.bf16 %v2977_v29  ;;  %v2978_v39 = vunpack.i.l.bf16 %v2977_v29 }
 0x16d   : > { %v2899_v42 = vpack.c.bf16 %v2979_v38, %v2978_v39 }
 0x16e   : > { %v979_v32 = vpop.permute.xlu0 %978  ;;  %v981_v41 = vpop.permute.xlu1 %980 }
 0x16f   : > { %2689 = vmatpush3.xpose.msk.msra.mxu1 %vm727_vm2, %v726_v27 }
 0x170   : > { %2891 = vmatprep.subr.bf16.mxu1 %v3076_v3 }
 0x172   : > { %2691 = vmatmul.mubr.msk.f32.vlgmr.msra.gmra.mrb[0].mxu1 %vm727_vm2, %v705_v15  ;;  %v1244_v35 = vpop.permute.xlu0 %1243  ;;  %v2982_v44 = vpop.permute.xlu1 %2981 }
 0x173   : > { %2894 = vmatpush3.bf16.xpose.msk.msra.mxu1 %vm3253_vm3, %v2892_v34  ;;  %2693 = vmatprep.mubr.msk.f32.mxu1 %vm3077_vm0, %v3078_v6  ;;  %v2984_v46 = vunpack.i.h.bf16 %v2982_v44  ;;  %v2983_v47 = vunpack.i.l.bf16 %v2982_v44 }
 0x174   : > { %2718 = vmatprep.subr.mxu1 %v3078_v6 }
 0x175   : > { %v2906_v51 = vpack.c.bf16 %v2984_v46, %v2983_v47 }
 0x176   : > { %2694 = vmatmul.mubr.msk.f32.gmra.mrb[2].mxu1 %vm727_vm2, %v710_v16  ;;  %v1234_v37 = vpop.permute.xlu0 %1233  ;;  %v1236_v53 = vpop.permute.xlu1 %1235 }
 0x177   : > { %2696 = vmatprep.mubr.msk.f32.mxu1 %vm3077_vm0, %v3078_v6 }
 0x17a   : > { %2697 = vmatmul.mubr.msk.f32.gmra.mrb[4].mxu1 %vm727_vm2, %v3238_v20  ;;  %v1238_v40 = vpop.permute.xlu0 %1237  ;;  %v1501_v54 = vpop.permute.xlu1 %1500 }
 0x17b   : > { %2719 = vmatpush3.xpose.msk.msra.mxu1 %vm727_vm2, %v987_v33  ;;  %2720 = vmatprep.mubr.msk.f32.mxu1 %vm3077_vm0, %v3078_v6 }
 0x17c   : > { %2898 = vmatprep.subr.bf16.mxu1 %v3076_v3 }
 0x17e   : > { %2721 = vmatmul.mubr.msk.f32.vlgmr.msra.gmra.mrb[6].mxu1 %vm727_vm2, %v977_v36  ;;  %v1491_v43 = vpop.permute.xlu0 %1490  ;;  %v1493_v55 = vpop.permute.xlu1 %1492 }
 0x17f   : > { %2901 = vmatpush3.bf16.xpose.msk.msra.mxu1 %vm3253_vm3, %v2899_v42  ;;  %2723 = vmatprep.mubr.msk.f32.mxu1 %vm3077_vm0, %v3078_v6 }
 0x180   : > { %2748 = vmatprep.subr.mxu1 %v3078_v6 }
 0x182   : > { %2724 = vmatmul.mubr.msk.f32.gmra.mrb[8].mxu1 %vm727_vm2, %v979_v32  ;;  %v1495_v45 = vpop.permute.xlu0 %1494 }
 0x183   : > { %2726 = vmatprep.mubr.msk.f32.mxu1 %vm3077_vm0, %v3078_v6 }
 0x186   : > { %2727 = vmatmul.mubr.msk.f32.gmra.mrb[10].mxu1 %vm727_vm2, %v981_v41  ;;  %v2987_v48 = vpop.permute.xlu0 %2986 }
 0x187   : > { %v2989_v49 = vunpack.i.h.bf16 %v2987_v48  ;;  %v2988_v50 = vunpack.i.l.bf16 %v2987_v48  ;;  %2749 = vmatpush3.xpose.msk.msra.mxu1 %vm727_vm2, %v1244_v35  ;;  %2750 = vmatprep.mubr.msk.f32.mxu1 %vm3077_vm0, %v3078_v6 }
 0x188   : > { %2905 = vmatprep.subr.bf16.mxu1 %v3076_v3 }
 0x189   : > { %v2889_v52 = vpack.c.bf16 %v2989_v49, %v2988_v50 }
 0x18a   : > { %2751 = vmatmul.mubr.msk.f32.vlgmr.msra.gmra.mrb[12].mxu1 %vm727_vm2, %v1234_v37 }
 0x18b   : > { %2890 = vmatpush3.bf16.msra.mxu0 %v2889_v52  ;;  %2908 = vmatpush3.bf16.xpose.msk.msra.mxu1 %vm3253_vm3, %v2906_v51 }
 0x18c   : > { %2753 = vmatprep.mubr.msk.f32.mxu1 %vm3077_vm0, %v3078_v6  ;;  %2778 = vmatprep.subr.mxu1 %v3078_v6 }
 0x18d   : > { %2703 = vmatprep.subr.mxu0 %v3078_v6 }
 0x18e   : > { %2754 = vmatmul.mubr.msk.f32.gmra.mrb[14].mxu1 %vm727_vm2, %v1236_v53 }
 0x18f   : > { %2756 = vmatprep.mubr.msk.f32.mxu1 %vm3077_vm0, %v3078_v6 }
 0x192   : > { %2757 = vmatmul.mubr.msk.f32.gmra.mrb[16].mxu1 %vm727_vm2, %v1238_v40 }
 0x193   : > { %2779 = vmatpush3.xpose.msk.msra.mxu1 %vm727_vm2, %v1501_v54  ;;  %2780 = vmatprep.mubr.msk.f32.mxu1 %vm3077_vm0, %v3078_v6 }
 0x194   : > { %2912 = vmatprep.subr.bf16.mxu1 %v3076_v3 }
 0x196   : > { %2781 = vmatmul.mubr.msk.f32.vlgmr.msra.gmra.mrb[18].mxu1 %vm727_vm2, %v1491_v43 }
 0x197   : > { %2783 = vmatprep.mubr.msk.f32.mxu1 %vm3077_vm0, %v3078_v6 }
 0x19a   : > { %2784 = vmatmul.mubr.msk.f32.gmra.mrb[20].mxu1 %vm727_vm2, %v1493_v55 }
 0x19b   : > { %2786 = vmatprep.mubr.msk.f32.mxu1 %vm3077_vm0, %v3078_v6 }
 0x19e   : > { %2787 = vmatmul.mubr.msk.f32.gmra.mrb[22].mxu1 %vm727_vm2, %v1495_v45 }
 0x19f   : > { %2812 = vmatprep.mubr.msk.f32.mxu1 %vm3077_vm0, %v3078_v6 }
 0x245   : > { %v806_v56 = vpop.f32.mrb[0].mxu1 }
 0x246   : > { %v3315_v57 = vmul.f32 0.35355338, %v806_v56  ;;  %v2692_v58 = vpop.f32.mrb[1].mxu1 }
 0x248   : > { %v824_v59 = vsel %vm823_vm4, %v3315_v57, -inf }
 0x249   : > { %825 = vmax.xlane.f32.xlu1 %v824_v59  ;;  %v811_v60 = vpop.f32.mrb[2].mxu1 }
 0x24a   : > { %v3319_v61 = vmul.f32 0.35355338, %v811_v60  ;;  %v2695_v62 = vpop.f32.mrb[3].mxu1 }
 0x24c   : > { %v827_v63 = vsel %vm823_vm4, %v3319_v61, -inf }
 0x24d   : > { %828 = vmax.xlane.f32.xlu0 %v827_v63  ;;  %v816_v0 = vpop.f32.mrb[4].mxu1 }
 0x24e   : > { %v3323_v1 = vmul.f32 0.35355338, %v816_v0  ;;  %v2698_v2 = vpop.f32.mrb[5].mxu1 }
 0x250   : > { %v831_v4 = vsel %vm830_vm5, %v3323_v1, -inf }
 0x251   : > { %832 = vmax.xlane.f32.xlu0 %v831_v4  ;;  %v1066_v5 = vpop.f32.mrb[6].mxu1 }
 0x252   : > { %v2722_v7 = vpop.f32.mrb[7].mxu1  ;;  %v1080_v34 = vmul.f32 0.35355338, %v1066_v5 }
 0x254   : > { %v1083_v36 = vsel %vm823_vm4, %v1080_v34, -inf }
 0x255   : > { %v1071_v8 = vpop.f32.mrb[8].mxu1 }
 0x256   : > { %v3327_v9 = vmul.f32 0.35355338, %v1071_v8  ;;  %v2725_v10 = vpop.f32.mrb[9].mxu1 }
 0x258   : > { %v1086_v11 = vsel %vm823_vm4, %v3327_v9, -inf }
 0x259   : > { %1087 = vmax.xlane.f32.xlu0 %v1086_v11  ;;  %v1076_v12 = vpop.f32.mrb[10].mxu1 }
 0x25a   : > { %868 = vrot.lane.b32.xlu1 %v3238_v20, %s3086_s20  ;;  %v2728_v13 = vpop.f32.mrb[11].mxu1  ;;  %v1082_v35 = vmul.f32 0.35355338, %v1076_v12 }
 0x25c   : > { %v1089_v38 = vsel %vm830_vm5, %v1082_v35, -inf }
 0x25d   : > { %v1323_v14 = vpop.f32.mrb[12].mxu1 }
 0x25e   : > { %v3333_v15 = vmul.f32 0.35355338, %v1323_v14  ;;  %v2752_v16 = vpop.f32.mrb[13].mxu1 }
 0x260   : > { %v1340_v17 = vsel %vm823_vm4, %v3333_v15, -inf }
 0x261   : > { %1341 = vmax.xlane.f32.xlu0 %v1340_v17  ;;  %v1328_v19 = vpop.f32.mrb[14].mxu1 }
 0x262   : > { %v2755_v21 = vpop.f32.mrb[15].mxu1  ;;  %v3346_v37 = vmul.f32 0.35355338, %v1328_v19 }
 0x264   : > { %v1343_v40 = vsel %vm823_vm4, %v3346_v37, -inf }
 0x265   : > { %v1333_v22 = vpop.f32.mrb[16].mxu1 }
 0x266   : > { %v3337_v23 = vmul.f32 0.35355338, %v1333_v22  ;;  %v2758_v24 = vpop.f32.mrb[17].mxu1 }
 0x268   : > { %v1346_v25 = vsel %vm830_vm5, %v3337_v23, -inf }
 0x269   : > { %1347 = vmax.xlane.f32.xlu0 %v1346_v25  ;;  %v1580_v26 = vpop.f32.mrb[18].mxu1 }
 0x26a   : > { %v2782_v27 = vpop.f32.mrb[19].mxu1  ;;  %v3349_v39 = vmul.f32 0.35355338, %v1580_v26 }
 0x26c   : > { %v1597_v42 = vsel %vm823_vm4, %v3349_v39, -inf }
 0x26d   : > { %v1585_v28 = vpop.f32.mrb[20].mxu1 }
 0x26e   : > { %v3341_v29 = vmul.f32 0.35355338, %v1585_v28  ;;  %v2785_v30 = vpop.f32.mrb[21].mxu1 }
 0x270   : > { %v1600_v31 = vsel %vm823_vm4, %v3341_v29, -inf }
 0x271   : > { %1601 = vmax.xlane.f32.xlu0 %v1600_v31  ;;  %v1590_v32 = vpop.f32.mrb[22].mxu1 }
 0x272   : > { %v2788_v33 = vpop.f32.mrb[23].mxu1  ;;  %v3354_v41 = vmul.f32 0.35355338, %v1590_v32 }
 0x274   : > { %v1603_v43 = vsel %vm830_vm5, %v3354_v41, -inf }
 0x27e   : > { %1084 = vmax.xlane.f32.xlu1 %v1083_v36 }
 0x282   : > { %1090 = vmax.xlane.f32.xlu1 %v1089_v38 }
 0x286   : > { %1344 = vmax.xlane.f32.xlu1 %v1343_v40 }
 0x287   : > { %2991 = vrot.lane.b32.xlu0 %v3234_v18, %s3087_s21 }
 0x28a   : > { %1598 = vmax.xlane.f32.xlu1 %v1597_v42 }
 0x28e   : > { %1604 = vmax.xlane.f32.xlu1 %v1603_v43 }
 0x29f   : > { %1126 = vrot.lane.b32.xlu1 %v3238_v20, %s3087_s21 }
 0x2d6   : > { %v826_v44 = vpop.xlane.xlu1 %825 }
 0x2d7   : > { %v834_v45 = vsub.f32 %v3315_v57, %v826_v44 }
 0x2d9   : > { %v837_v46 = vmul.f32 1.442695, %v834_v45 }
 0x2da   : > { %v869_v47 = vpop.permute.xlu1 %868  ;;  %v829_v48 = vpop.xlane.xlu0 %828 }
 0x2db   : > { %3005 = vpow2.f32 %v837_v46  ;;  %v835_v49 = vsub.f32 %v3319_v61, %v829_v48  ;;  %2704 = vmatpush3.msk.msra.mxu0 %vm881_vm6, %v869_v47 }
 0x2dc   : > { %2895 = vmatprep.subr.bf16.mxu0 %v3076_v3 }
 0x2dd   : > { %v839_v50 = vmul.f32 1.442695, %v835_v49 }
 0x2de   : > { %v833_v51 = vpop.xlane.xlu0 %832 }
 0x2df   : > { %3007 = vpow2.f32 %v839_v50  ;;  %v836_v52 = vsub.f32 %v3323_v1, %v833_v51 }
 0x2e1   : > { %v841_v53 = vmul.f32 1.442695, %v836_v52 }
 0x2e3   : > { %3009 = vpow2.f32 %v841_v53 }
 0x2e5   : > { %v3366_v54 = vpop.eup %3005 }
 0x2e6   : > { %v1088_v55 = vpop.xlane.xlu0 %1087  ;;  %v843_v56 = vsel %vm823_vm4, %v3366_v54, 0.0 }
 0x2e7   : > { %v1093_v57 = vsub.f32 %v3327_v9, %v1088_v55  ;;  %844 = vadd.xlane.f32.xlu0 %v843_v56 }
 0x2e9   : > { %v3371_v58 = vpop.eup %3007  ;;  %v1097_v59 = vmul.f32 1.442695, %v1093_v57 }
 0x2ea   : > { %v846_v60 = vsel %vm823_vm4, %v3371_v58, 0.0 }
 0x2eb   : > { %3011 = vpow2.f32 %v1097_v59  ;;  %847 = vadd.xlane.f32.xlu1 %v846_v60 }
 0x2ed   : > { %v3375_v61 = vpop.eup %3009 }
 0x2ee   : > { %v849_v62 = vsel %vm830_vm5, %v3375_v61, 0.0  ;;  %v1342_v1 = vpop.xlane.xlu0 %1341 }
 0x2ef   : > { %850 = vadd.xlane.f32.xlu0 %v849_v62  ;;  %v1349_v5 = vsub.f32 %v3333_v15, %v1342_v1 }
 0x2f1   : > { %v1352_v11 = vmul.f32 1.442695, %v1349_v5 }
 0x2f5   : > { %v3379_v63 = vpop.eup %3011 }
 0x2f6   : > { %v1104_v0 = vsel %vm823_vm4, %v3379_v63, 0.0  ;;  %v1348_v8 = vpop.xlane.xlu0 %1347 }
 0x2f7   : > { %1105 = vadd.xlane.f32.xlu0 %v1104_v0  ;;  %v1351_v12 = vsub.f32 %v3337_v23, %v1348_v8 }
 0x2f9   : > { %v1356_v17 = vmul.f32 1.442695, %v1351_v12 }
 0x2fe   : > { %v1602_v19 = vpop.xlane.xlu0 %1601 }
 0x2ff   : > { %v1607_v15 = vsub.f32 %v3341_v29, %v1602_v19 }
 0x301   : > { %v1611_v30 = vmul.f32 1.442695, %v1607_v15 }
 0x302   : > { %v2992_v45 = vpop.permute.xlu0 %2991 }
 0x303   : > { %v2994_v51 = vunpack.i.h.bf16 %v2992_v45  ;;  %v2993_v52 = vunpack.i.l.bf16 %v2992_v45 }
 0x30b   : > { %v1085_v2 = vpop.xlane.xlu1 %1084 }
 0x30c   : > { %v1092_v4 = vsub.f32 %v1080_v34, %v1085_v2 }
 0x30d   : > { %2996 = vrot.lane.b32.xlu0 %v3234_v18, %s3088_s22 }
 0x30e   : > { %v1095_v7 = vmul.f32 1.442695, %v1092_v4 }
 0x30f   : > { %v1091_v9 = vpop.xlane.xlu1 %1090 }
 0x310   : > { %3013 = vpow2.f32 %v1095_v7  ;;  %v1094_v10 = vsub.f32 %v1082_v35, %v1091_v9 }
 0x312   : > { %v1099_v13 = vmul.f32 1.442695, %v1094_v10 }
 0x313   : > { %v1345_v14 = vpop.xlane.xlu1 %1344 }
 0x314   : > { %3015 = vpow2.f32 %v1099_v13  ;;  %v1350_v16 = vsub.f32 %v3346_v37, %v1345_v14 }
 0x315   : > { %3017 = vpow2.f32 %v1352_v11 }
 0x316   : > { %v1354_v24 = vmul.f32 1.442695, %v1350_v16  ;;  %3019 = vpow2.f32 %v1356_v17 }
 0x317   : > { %v1599_v21 = vpop.xlane.xlu1 %1598 }
 0x318   : > { %v1606_v22 = vsub.f32 %v3349_v39, %v1599_v21  ;;  %3021 = vpow2.f32 %v1354_v24 }
 0x31a   : > { %v3390_v25 = vpop.eup %3013  ;;  %v1609_v26 = vmul.f32 1.442695, %v1606_v22 }
 0x31b   : > { %v1605_v27 = vpop.xlane.xlu1 %1604  ;;  %v1101_v23 = vsel %vm823_vm4, %v3390_v25, 0.0 }
 0x31c   : > { %v1608_v28 = vsub.f32 %v3354_v41, %v1605_v27  ;;  %1102 = vadd.xlane.f32.xlu1 %v1101_v23  ;;  %3023 = vpow2.f32 %v1609_v26 }
 0x31d   : > { %3025 = vpow2.f32 %v1611_v30 }
 0x31e   : > { %v3395_v31 = vpop.eup %3015  ;;  %v1613_v32 = vmul.f32 1.442695, %v1608_v28 }
 0x31f   : > { %v1107_v29 = vsel %vm830_vm5, %v3395_v31, 0.0  ;;  %v3399_v33 = vpop.eup %3017  ;;  %v1127_v46 = vpop.permute.xlu1 %1126 }
 0x320   : > { %1108 = vadd.xlane.f32.xlu1 %v1107_v29  ;;  %3027 = vpow2.f32 %v1613_v32  ;;  %v1358_v34 = vsel %vm823_vm4, %v3399_v33, 0.0  ;;  %v3403_v35 = vpop.eup %3019 }
 0x321   : > { %v1364_v37 = vsel %vm830_vm5, %v3403_v35, 0.0 }
 0x322   : > { %v3405_v36 = vpop.eup %3021 }
 0x323   : > { %v1361_v40 = vsel %vm823_vm4, %v3405_v36, 0.0 }
 0x324   : > { %1359 = vadd.xlane.f32.xlu1 %v1358_v34 }
 0x326   : > { %v3409_v38 = vpop.eup %3023 }
 0x327   : > { %v3411_v39 = vpop.eup %3025  ;;  %v1615_v41 = vsel %vm823_vm4, %v3409_v38, 0.0 }
 0x328   : > { %1365 = vadd.xlane.f32.xlu1 %v1364_v37  ;;  %v1618_v43 = vsel %vm823_vm4, %v3411_v39, 0.0 }
 0x32a   : > { %v3417_v42 = vpop.eup %3027 }
 0x32b   : > { %v1621_v44 = vsel %vm830_vm5, %v3417_v42, 0.0 }
 0x32c   : > { %1362 = vadd.xlane.f32.xlu0 %v1361_v40  ;;  %1616 = vadd.xlane.f32.xlu1 %v1615_v41 }
 0x330   : > { %1619 = vadd.xlane.f32.xlu0 %v1618_v43  ;;  %1622 = vadd.xlane.f32.xlu1 %v1621_v44 }
 0x341   : > { %1383 = vrot.lane.b32.xlu1 %v3238_v20, %s3088_s22 }
 0x346   : > { %3001 = vrot.lane.b32.xlu0 %v3234_v18, %s3089_s25  ;;  %v2896_v18 = vpack.c.bf16 %v2994_v51, %v2993_v52 }
 0x34a   : > { %1640 = vrot.lane.b32.xlu0 %v3238_v20, %s3089_s25 }
 0x374   : > { %v845_v47 = vpop.xlane.xlu0 %844 }
 0x375   : > { %3029 = vrcp.f32 %v845_v47 }
 0x378   : > { %v848_v48 = vpop.xlane.xlu1 %847 }
 0x379   : > { %3031 = vrcp.f32 %v848_v48 }
 0x37c   : > { %v851_v49 = vpop.xlane.xlu0 %850 }
 0x37d   : > { %3033 = vrcp.f32 %v851_v49 }
 0x37f   : > { %v3030_v50 = vpop.eup %3029 }
 0x380   : > { %v3428_v53 = vmul.f32 %v3030_v50, %v3366_v54 }
 0x382   : > { %vm858_vm7 = vcmp.ge.f32.partialorder %v3428_v53, 0.1 }
 0x383   : > { %v3032_v55 = vpop.eup %3031  ;;  %v861_v20 = vsel %vm858_vm7, %v3428_v53, 0.0  ;;  %v2517_v14 = vsel %vm858_vm7, 1.0, %v3078_v6 }
 0x384   : > { %2706 = vmatmul.mubr.msk.f32.vlgmr.msra.gmra.mrb[6].mxu0 %vm823_vm4, %v861_v20  ;;  %v1106_v56 = vpop.xlane.xlu0 %1105  ;;  %v3436_v57 = vmul.f32 %v3032_v55, %v3371_v58 }
 0x385   : > { %3035 = vrcp.f32 %v1106_v56  ;;  %2897 = vmatpush3.bf16.msra.mxu0 %v2896_v18  ;;  %2708 = vmatprep.mubr.msk.f32.mxu0 %vm3077_vm0, %v3078_v6 }
 0x386   : > { %2733 = vmatprep.subr.mxu0 %v3078_v6  ;;  %vm859_vm8 = vcmp.ge.f32.partialorder %v3436_v57, 0.1 }
 0x387   : > { %v3034_v54 = vpop.eup %3033  ;;  %v862_v59 = vsel %vm859_vm8, %v3436_v57, 0.0  ;;  %v2518_v0 = vsel %vm859_vm8, 1.0, %v3078_v6 }
 0x388   : > { %2709 = vmatmul.mubr.msk.f32.gmra.mrb[8].mxu0 %vm823_vm4, %v862_v59  ;;  %v3445_v60 = vmul.f32 %v3034_v54, %v3375_v61  ;;  %v2997_v7 = vpop.permute.xlu0 %2996  ;;  %v2231_v54 = vld [vmem:[%s3507_s29] sm:$0xff] }
 0x389   : > { %2734 = vmatpush3.msk.msra.mxu0 %vm881_vm6, %v1127_v46  ;;  %2711 = vmatprep.mubr.msk.f32.mxu0 %vm3077_vm0, %v3078_v6  ;;  %v2998_v10 = vunpack.i.l.bf16 %v2997_v7 }
 0x38a   : > { %vm860_vm9 = vcmp.ge.f32.partialorder %v3445_v60, 0.1  ;;  %2902 = vmatprep.subr.bf16.mxu0 %v3076_v3 }
 0x38b   : > { %v863_v58 = vsel %vm860_vm9, %v3445_v60, 0.0  ;;  %v2519_v26 = vsel %vm860_vm9, 1.0, %v3078_v6  ;;  %vm1786_vm9 = vcmask 130048  }
 0x38c   : > { %2712 = vmatmul.mubr.msk.f32.gmra.mrb[10].mxu0 %vm823_vm4, %v863_v58 }
 0x38d   : > { %2735 = vmatprep.mubr.msk.f32.mxu0 %vm3077_vm0, %v3078_v6 }
 0x38f   : > { %v3036_v61 = vpop.eup %3035 }
 0x390   : > { %v3459_v62 = vmul.f32 %v3036_v61, %v3379_v63  ;;  %v2999_v63 = vunpack.i.h.bf16 %v2997_v7 }
 0x392   : > { %vm1117_vm10 = vcmp.ge.f32.partialorder %v3459_v62, 0.1  ;;  %v2903_v16 = vpack.c.bf16 %v2999_v63, %v2998_v10  ;;  %v1222_v20 = vadd.f32 %v3459_v62, %v3436_v57 }
 0x393   : > { %v2531_v1 = vsel %vm1117_vm10, 1.0, %v3078_v6  ;;  %v1120_v27 = vsel %vm1117_vm10, %v3459_v62, 0.0  ;;  %vm1790_vm10 = vcmask 195584  }
 0x394   : > { %v3466_v2 = vadd.f32 %v2531_v1, %v2518_v0 }
 0x3a9   : > { %v1103_v4 = vpop.xlane.xlu1 %1102 }
 0x3aa   : > { %3037 = vrcp.f32 %v1103_v4 }
 0x3ad   : > { %v1109_v5 = vpop.xlane.xlu1 %1108 }
 0x3ae   : > { %3039 = vrcp.f32 %v1109_v5  ;;  %v2232_v5 = vld [vmem:[%s3507_s29 + $0x8] sm:$0xff] }
 0x3b1   : > { %v1360_v8 = vpop.xlane.xlu1 %1359 }
 0x3b2   : > { %3041 = vrcp.f32 %v1360_v8 }
 0x3b4   : > { %v3038_v9 = vpop.eup %3037 }
 0x3b5   : > { %v1113_v11 = vmul.f32 %v3038_v9, %v3390_v25  ;;  %v1366_v12 = vpop.xlane.xlu1 %1365  ;;  %v2233_v9 = vld [vmem:[%s3507_s29 + $0x10] sm:$0x1] }
 0x3b6   : > { %3043 = vrcp.f32 %v1366_v12 }
 0x3b7   : > { %vm1116_vm11 = vcmp.ge.f32.partialorder %v1113_v11, 0.1  ;;  %v1221_v47 = vadd.f32 %v1113_v11, %v3428_v53 }
 0x3b8   : > { %v3040_v13 = vpop.eup %3039  ;;  %v1119_v17 = vsel %vm1116_vm11, %v1113_v11, 0.0  ;;  %v2530_v19 = vsel %vm1116_vm11, 1.0, %v3078_v6 }
 0x3b9   : > { %v1363_v21 = vpop.xlane.xlu0 %1362  ;;  %2736 = vmatmul.mubr.msk.f32.vlgmr.msra.gmra.mrb[12].mxu0 %vm823_vm4, %v1119_v17  ;;  %v1230_v22 = vadd.f32 %v2530_v19, %v2517_v14  ;;  %v1617_v15 = vpop.xlane.xlu1 %1616  ;;  %v1115_v24 = vmul.f32 %v3040_v13, %v3395_v31 }
 0x3ba   : > { %3045 = vrcp.f32 %v1363_v21  ;;  %2904 = vmatpush3.bf16.msra.mxu0 %v2903_v16  ;;  %2738 = vmatprep.mubr.msk.f32.mxu0 %vm3077_vm0, %v3078_v6 }
 0x3bb   : > { %3047 = vrcp.f32 %v1617_v15  ;;  %vm1118_vm12 = vcmp.ge.f32.partialorder %v1115_v24, 0.1  ;;  %2763 = vmatprep.subr.mxu0 %v3078_v6  ;;  %v1223_v51 = vadd.f32 %v1115_v24, %v3445_v60 }
 0x3bc   : > { %v3042_v25 = vpop.eup %3041  ;;  %v2532_v23 = vsel %vm1118_vm12, 1.0, %v3078_v6  ;;  %v1121_v34 = vsel %vm1118_vm12, %v1115_v24, 0.0 }
 0x3bd   : > { %v1370_v28 = vmul.f32 %v3042_v25, %v3399_v33  ;;  %v1620_v30 = vpop.xlane.xlu0 %1619  ;;  %2739 = vmatmul.mubr.msk.f32.gmra.mrb[14].mxu0 %vm823_vm4, %v1120_v27  ;;  %v1623_v31 = vpop.xlane.xlu1 %1622  ;;  %v1232_v32 = vadd.f32 %v2532_v23, %v2519_v26 }
 0x3be   : > { %3049 = vrcp.f32 %v1620_v30  ;;  %2741 = vmatprep.mubr.msk.f32.mxu0 %vm3077_vm0, %v3078_v6  ;;  %v1794_v30 = vld [vmem:[%s3746_s5] sm:$0xff] }
 0x3bf   : > { %3051 = vrcp.f32 %v1623_v31  ;;  %vm1373_vm13 = vcmp.ge.f32.partialorder %v1370_v28, 0.1  ;;  %v1478_v55 = vadd.f32 %v1370_v28, %v1221_v47  ;;  %v1795_v31 = vld [vmem:[%s3746_s5 + $0x8] sm:$0xff] }
 0x3c0   : > { %v3044_v29 = vpop.eup %3043  ;;  %v2543_v37 = vsel %vm1373_vm13, 1.0, %v3078_v6  ;;  %v1376_v49 = vsel %vm1373_vm13, %v1370_v28, 0.0 }
 0x3c1   : > { %v3002_v40 = vpop.permute.xlu0 %3001  ;;  %2742 = vmatmul.mubr.msk.f32.gmra.mrb[16].mxu0 %vm823_vm4, %v1121_v34  ;;  %v1384_v33 = vpop.permute.xlu1 %1383  ;;  %v1487_v41 = vadd.f32 %v2543_v37, %v1230_v22  ;;  %v1372_v43 = vmul.f32 %v3044_v29, %v3403_v35  ;;  %v2913_v34 = vpack.c.bf16 %v1795_v31, %v1794_v30  ;;  %v1797_v37 = vld [vmem:[%s3746_s5 + $0x18] sm:$0xff] }
 0x3c2   : > { %v3004_v44 = vunpack.i.h.bf16 %v3002_v40  ;;  %v3003_v45 = vunpack.i.l.bf16 %v3002_v40  ;;  %2764 = vmatpush3.msk.msra.mxu0 %vm881_vm6, %v1384_v33  ;;  %2765 = vmatprep.mubr.msk.f32.mxu0 %vm3077_vm0, %v3078_v6 }
 0x3c3   : > { %2909 = vmatprep.subr.bf16.mxu0 %v3076_v3  ;;  %vm1375_vm14 = vcmp.ge.f32.partialorder %v1372_v43, 0.1  ;;  %v1480_v56 = vadd.f32 %v1372_v43, %v1223_v51  ;;  %2914 = vmatpush3.bf16.msra.mxu1 %v2913_v34 }
 0x3c4   : > { %v3046_v46 = vpop.eup %3045  ;;  %v2910_v48 = vpack.c.bf16 %v3004_v44, %v3003_v45  ;;  %v2545_v50 = vsel %vm1375_vm14, 1.0, %v3078_v6  ;;  %v1378_v63 = vsel %vm1375_vm14, %v1372_v43, 0.0  ;;  %2915 = vmatprep.subr.bf16.mxu1 %v3076_v3 }
 0x3c5   : > { %v3048_v35 = vpop.eup %3047  ;;  %2766 = vmatmul.mubr.msk.f32.vlgmr.msra.gmra.mrb[18].mxu0 %vm823_vm4, %v1376_v49  ;;  %v1371_v52 = vmul.f32 %v3046_v46, %v3405_v36  ;;  %v1489_v53 = vadd.f32 %v2545_v50, %v1232_v32  ;;  %v1641_v61 = vpop.permute.xlu0 %1640  ;;  %v1796_v32 = vld [vmem:[%s3746_s5 + $0x10] sm:$0xff] }
 0x3c6   : > { %v1627_v18 = vmul.f32 %v3048_v35, %v3409_v38  ;;  %2911 = vmatpush3.bf16.msra.mxu0 %v2910_v48  ;;  %2768 = vmatprep.mubr.msk.f32.mxu0 %vm3077_vm0, %v3078_v6  ;;  %v2916_v40 = vpack.c.bf16 %v1797_v37, %v1796_v32 }
 0x3c7   : > { %vm1374_vm15 = vcmp.ge.f32.partialorder %v1371_v52, 0.1  ;;  %2793 = vmatprep.subr.mxu0 %v3078_v6  ;;  %v1479_v0 = vadd.f32 %v1371_v52, %v1222_v20 }
 0x3c8   : > { %v3050_v59 = vpop.eup %3049  ;;  %v1735_v36 = vadd.f32 %v1627_v18, %v1478_v55  ;;  %v1377_v60 = vsel %vm1374_vm15, %v1371_v52, 0.0  ;;  %v2544_v58 = vsel %vm1374_vm15, 1.0, %v3078_v6  ;;  %vm1630_vm3 = vcmp.ge.f32.partialorder %v1627_v18, 0.1  ;;  %2917 = vmatpush3.bf16.msra.mxu1 %v2916_v40 }
 0x3c9   : > { %v3052_v38 = vpop.eup %3051  ;;  %2769 = vmatmul.mubr.msk.f32.gmra.mrb[20].mxu0 %vm823_vm4, %v1377_v60  ;;  %v1488_v57 = vadd.f32 %v2544_v58, %v3466_v2  ;;  %v2556_v62 = vsel %vm1630_vm3, 1.0, %v3078_v6  ;;  %v1628_v1 = vmul.f32 %v3050_v59, %v3411_v39  ;;  %v1633_v16 = vsel %vm1630_vm3, %v1627_v18, 0.0  ;;  %2924 = vmatprep.subr.bf16.mxu1 %v3076_v3 }
 0x3ca   : > { %2794 = vmatpush3.msk.msra.mxu0 %vm881_vm6, %v1641_v61  ;;  %2771 = vmatprep.mubr.msk.f32.mxu0 %vm3077_vm0, %v3078_v6  ;;  %v3532_v4 = vadd.f32 %v2556_v62, %v1487_v41  ;;  %v2234_v7 = vadd.f32 %v2231_v54, %v1735_v36  ;;  %v1629_v2 = vmul.f32 %v3052_v38, %v3417_v42 }
 0x3cb   : > { %vm1631_vm7 = vcmp.ge.f32.partialorder %v1628_v1, 0.1  ;;  %v1736_v8 = vadd.f32 %v1628_v1, %v1479_v0  ;;  %2918 = vmatprep.subr.bf16.mxu0 %v3076_v3 }
 0x3cc   : > { %v2557_v39 = vsel %vm1631_vm7, 1.0, %v3078_v6  ;;  %2237 = vst.msk [vmem:[%s608_s18] sm:$0xff] %vm823_vm4, %v2234_v7  ;;  %vm1632_vm8 = vcmp.ge.f32.partialorder %v1629_v2, 0.1  ;;  %v1737_v10 = vadd.f32 %v1629_v2, %v1480_v56  ;;  %v1634_v17 = vsel %vm1631_vm7, %v1628_v1, 0.0 }
 0x3cd   : > { %2772 = vmatmul.mubr.msk.f32.gmra.mrb[22].mxu0 %vm823_vm4, %v1378_v63  ;;  %v3543_v11 = vadd.f32 %v2557_v39, %v1488_v57  ;;  %v2235_v12 = vadd.f32 %v2232_v5, %v1736_v8  ;;  %v2558_v42 = vsel %vm1632_vm8, 1.0, %v3078_v6  ;;  %v1635_v19 = vsel %vm1632_vm8, %v1629_v2, 0.0  ;;  %v2559_v8 = vld [vmem:[%s3747_s6] ss:$0 sm:$0xff] }
 0x3ce   : > { %2795 = vmatprep.mubr.msk.f32.mxu0 %vm3077_vm0, %v3078_v6  ;;  %v3549_v13 = vadd.f32 %v2558_v42, %v1489_v53  ;;  %v2236_v14 = vadd.f32 %v2233_v9, %v1737_v10  ;;  %v3065_v10 = vld [vmem:[%s3216_s23] sm:$0xff] }
 0x3cf   : > { %2238 = vst.msk [vmem:[%s608_s18 + $0x8] sm:$0xff] %vm823_vm4, %v2235_v12 }
 0x3d0   : > { %2239 = vst.msk [vmem:[%s608_s18 + $0x10] sm:$0x1] %vm830_vm5, %v2236_v14 }
 0x3d1   : > { %2796 = vmatmul.mubr.msk.f32.vlgmr.msra.gmra.mrb[24].mxu0 %vm823_vm4, %v1633_v16 }
 0x3d2   : > { %2798 = vmatprep.mubr.msk.f32.mxu0 %vm3077_vm0, %v3078_v6 }
 0x3d5   : > { %2799 = vmatmul.mubr.msk.f32.gmra.mrb[26].mxu0 %vm823_vm4, %v1634_v17 }
 0x3d6   : > { %2801 = vmatprep.mubr.msk.f32.mxu0 %vm3077_vm0, %v3078_v6 }
 0x3d9   : > { %2802 = vmatmul.mubr.msk.f32.gmra.mrb[28].mxu0 %vm823_vm4, %v1635_v19  ;;  %v3066_v19 = vld [vmem:[%s3216_s23 + $0x8] sm:$0xff] }
 0x3da   : > { %2829 = vmatprep.mubr.msk.f32.mxu0 %vm3077_vm0, %v3078_v6 }
 0x457   : > { %v950_v21 = vpop.f32.mrb[6].mxu0 }
 0x458   : > { %v2707_v22 = vpop.f32.mrb[7].mxu0 }
 0x45b   : > { %v955_v15 = vpop.f32.mrb[8].mxu0 }
 0x45c   : > { %v2710_v24 = vpop.f32.mrb[9].mxu0 }
 0x45f   : > { %v960_v25 = vpop.f32.mrb[10].mxu0 }
 0x460   : > { %v2713_v26 = vpop.f32.mrb[11].mxu0 }
 0x461   : > { %v3067_v26 = vld [vmem:[%s3216_s23 + $0x10] sm:$0x1] }
 0x48c   : > { %v1207_v27 = vpop.f32.mrb[12].mxu0 }
 0x48d   : > { %1750 = vrot.lane.b32.xlu1 %v1207_v27, %s3090_s19  ;;  %v2737_v23 = vpop.f32.mrb[13].mxu0 }
 0x490   : > { %v1212_v28 = vpop.f32.mrb[14].mxu0 }
 0x491   : > { %1752 = vrot.lane.b32.xlu0 %v1212_v28, %s3090_s19  ;;  %v2740_v29 = vpop.f32.mrb[15].mxu0 }
 0x494   : > { %v1217_v33 = vpop.f32.mrb[16].mxu0 }
 0x495   : > { %v2743_v41 = vpop.f32.mrb[17].mxu0 }
 0x498   : > { %v1464_v43 = vpop.f32.mrb[18].mxu0 }
 0x499   : > { %1762 = vrot.lane.b32.xlu0 %v1464_v43, %s3091_s0  ;;  %v2767_v44 = vpop.f32.mrb[19].mxu0 }
 0x49c   : > { %v1469_v45 = vpop.f32.mrb[20].mxu0 }
 0x49d   : > { %1764 = vrot.lane.b32.xlu1 %v1469_v45, %s3091_s0  ;;  %v2770_v46 = vpop.f32.mrb[21].mxu0 }
 0x4a0   : > { %v1474_v47 = vpop.f32.mrb[22].mxu0 }
 0x4a1   : > { %v2773_v48 = vpop.f32.mrb[23].mxu0 }
 0x4a2   : > { %v1958_v48 = vld [vmem:[%s3750_s9] sm:$0xff] }
 0x4a4   : > { %v1721_v49 = vpop.f32.mrb[24].mxu0 }
 0x4a5   : > { %1774 = vrot.lane.b32.xlu1 %v1721_v49, %s3092_s30  ;;  %v2797_v50 = vpop.f32.mrb[25].mxu0  ;;  %v1959_v49 = vld [vmem:[%s3750_s9 + $0x8] sm:$0xff] }
 0x4a6   : > { %v2919_v50 = vpack.c.bf16 %v1959_v49, %v1958_v48 }
 0x4a8   : > { %v1726_v35 = vpop.f32.mrb[26].mxu0  ;;  %2920 = vmatpush3.bf16.msra.mxu0 %v2919_v50 }
 0x4a9   : > { %1754 = vrot.lane.b32.xlu1 %v1217_v33, %s3090_s19  ;;  %1776 = vrot.lane.b32.xlu0 %v1726_v35, %s3092_s30  ;;  %v2800_v51 = vpop.f32.mrb[27].mxu0  ;;  %v1960_v35 = vld [vmem:[%s3750_s9 + $0x10] sm:$0xff] }
 0x4aa   : > { %2921 = vmatprep.subr.bf16.mxu0 %v3076_v3  ;;  %v1961_v51 = vld [vmem:[%s3750_s9 + $0x18] sm:$0xff] }
 0x4ac   : > { %v1731_v52 = vpop.f32.mrb[28].mxu0 }
 0x4ad   : > { %1766 = vrot.lane.b32.xlu0 %v1474_v47, %s3091_s0  ;;  %1778 = vrot.lane.b32.xlu1 %v1731_v52, %s3092_s30  ;;  %v2803_v53 = vpop.f32.mrb[29].mxu0  ;;  %v2922_v52 = vpack.c.bf16 %v1961_v51, %v1960_v35  ;;  %s598_s0 = scalar_lea.vmem %s3743_s2, %s3210_s1 }
 0x4ae   : > { %v2061_v53 = vld [vmem:[%s3752_s11] sm:$0xff] }
 0x4af   : > { %2923 = vmatpush3.bf16.msra.mxu0 %v2922_v52 }
 0x4b0   : > { %2936 = vmatprep.subr.bf16.mxu0 %v3076_v3 }
 0x4ff   : > { %v1751_v55 = vpop.permute.xlu1 %1750 }
 0x500   : > { %v1783_v54 = vsel %vm727_vm2, %v950_v21, %v1751_v55  ;;  %v2062_v55 = vld [vmem:[%s3752_s11 + $0x8] sm:$0xff] }
 0x503   : > { %v1753_v18 = vpop.permute.xlu0 %1752 }
 0x504   : > { %v1784_v58 = vsel %vm727_vm2, %v955_v15, %v1753_v18  ;;  %v2063_v18 = vld [vmem:[%s3752_s11 + $0x10] sm:$0xff] }
 0x50b   : > { %v1763_v56 = vpop.permute.xlu0 %1762 }
 0x50c   : > { %v1787_v59 = vsel %vm1786_vm9, %v1783_v54, %v1763_v56  ;;  %v2064_v56 = vld [vmem:[%s3752_s11 + $0x18] sm:$0xff] }
 0x50d   : > { %v2928_v54 = vpack.c.bf16 %v2064_v56, %v2063_v18 }
 0x50f   : > { %v1765_v20 = vpop.permute.xlu1 %1764 }
 0x510   : > { %v1788_v38 = vsel %vm1786_vm9, %v1784_v58, %v1765_v20  ;;  %v2925_v20 = vpack.c.bf16 %v2062_v55, %v2061_v53  ;;  %v2569_v55 = vld [vmem:[%s3753_s12] ss:$0 sm:$0xff] }
 0x517   : > { %v1775_v36 = vpop.permute.xlu1 %1774 }
 0x518   : > { %v1791_v60 = vsel %vm1790_vm10, %v1787_v59, %v1775_v36  ;;  %v2065_v59 = vld [vmem:[%s3752_s11 + $0x20] sm:$0xff]  ;;  %v2066_v36 = vld [vmem:[%s3752_s11 + $0x28] sm:$0xff] }
 0x519   : > { %2813 = vmatmul.mubr.msk.f32.vlgmr.msra.gmra.mrb[24].mxu1 %vm628_vm1, %v1791_v60  ;;  %v2931_v60 = vpack.c.bf16 %v2066_v36, %v2065_v59 }
 0x51a   : > { %2815 = vmatprep.mubr.msk.f32.mxu1 %vm3077_vm0, %v3078_v6  ;;  %2926 = vmatpush3.bf16.msra.mxu1 %v2925_v20 }
 0x51b   : > { %v1755_v61 = vpop.permute.xlu1 %1754  ;;  %v1777_v0 = vpop.permute.xlu0 %1776  ;;  %2927 = vmatprep.subr.bf16.mxu1 %v3076_v3 }
 0x51c   : > { %v1792_v57 = vsel %vm1790_vm10, %v1788_v38, %v1777_v0  ;;  %v1785_v62 = vsel %vm727_vm2, %v960_v25, %v1755_v61  ;;  %vm1905_vm2 = vcmask 253952  }
 0x51d   : > { %2816 = vmatmul.mubr.msk.f32.gmra.mrb[26].mxu1 %vm628_vm1, %v1792_v57 }
 0x51e   : > { %2818 = vmatprep.mubr.msk.f32.mxu1 %vm3077_vm0, %v3078_v6  ;;  %2929 = vmatpush3.bf16.msra.mxu1 %v2928_v54 }
 0x51f   : > { %v1767_v1 = vpop.permute.xlu0 %1766  ;;  %v1779_v5 = vpop.permute.xlu1 %1778  ;;  %2930 = vmatprep.subr.bf16.mxu1 %v3076_v3 }
 0x520   : > { %v1789_v7 = vsel %vm1786_vm9, %v1785_v62, %v1767_v1 }
 0x521   : > { %v1793_v2 = vsel %vm1790_vm10, %v1789_v7, %v1779_v5 }
 0x522   : > { %2819 = vmatmul.mubr.msk.f32.gmra.mrb[28].mxu1 %vm628_vm1, %v1793_v2 }
 0x523   : > { %2854 = vmatprep.mubr.msk.f32.mxu1 %vm3077_vm0, %v3078_v6  ;;  %2932 = vmatpush3.bf16.msra.mxu1 %v2931_v60 }
 0x524   : > { %2933 = vmatprep.subr.bf16.mxu1 %v3076_v3  ;;  %v2563_v3 = vld [vmem:[%s3748_s7] ss:$0 sm:$0xff] }
 0x5ec   : > { %v1880_v9 = vpop.f32.mrb[24].mxu1 }
 0x5ed   : > { %v1881_v63 = vadd.f32 %v2559_v8, %v1880_v9  ;;  %v2814_v39 = vpop.f32.mrb[25].mxu1  ;;  %v2240_v9 = vld [vmem:[%s598_s0] sm:$0xff] }
 0x5ee   : > { %v2564_v39 = vld [vmem:[%s3749_s8] ss:$0 sm:$0xff] }
 0x5ef   : > { %v1894_v12 = vadd.f32 %v3065_v10, %v1881_v63  ;;  %v2241_v63 = vld [vmem:[%s598_s0 + $0x8] sm:$0xff] }
 0x5f0   : > { %v1885_v42 = vpop.f32.mrb[26].mxu1 }
 0x5f1   : > { %v1886_v14 = vadd.f32 %v2559_v8, %v1885_v42  ;;  %v2817_v16 = vpop.f32.mrb[27].mxu1  ;;  %v1899_v17 = vsel %vm628_vm1, %v1894_v12, 0.0  ;;  %v2937_v42 = vpack.c.bf16 %v2241_v63, %v2240_v9 }
 0x5f2   : > { %1900 = vadd.xlane.f32.xlu0 %v1899_v17 }
 0x5f3   : > { %v1895_v21 = vadd.f32 %v3066_v19, %v1886_v14 }
 0x5f5   : > { %v1890_v22 = vpop.f32.mrb[28].mxu1  ;;  %v1902_v15 = vsel %vm628_vm1, %v1895_v21, 0.0 }
 0x5f6   : > { %v1891_v24 = vadd.f32 %v2559_v8, %v1890_v22  ;;  %1903 = vadd.xlane.f32.xlu1 %v1902_v15  ;;  %v2820_v25 = vpop.f32.mrb[29].mxu1  ;;  %v2242_v22 = vld [vmem:[%s598_s0 + $0x10] sm:$0x1]  ;;  %s613_s0 = scalar_lea.vmem %s3758_s17, %s3210_s1 }
 0x5f8   : > { %v1896_v27 = vadd.f32 %v3067_v26, %v1891_v24  ;;  %v2067_v26 = vld [vmem:[%s3752_s11 + $0x30] sm:$0xff] }
 0x5fa   : > { %v1906_v23 = vsel %vm1905_vm2, %v1896_v27, 0.0 }
 0x5fb   : > { %1907 = vadd.xlane.f32.xlu0 %v1906_v23 }
 0x67f   : > { %v1901_v28 = vpop.xlane.xlu0 %1900 }
 0x680   : > { %v1910_v30 = vmul.f32 0.03125, %v1901_v28 }
 0x682   : > { %v1913_v31 = vsub.f32 %v1894_v12, %v1910_v30 }
 0x683   : > { %v1904_v32 = vpop.xlane.xlu1 %1903 }
 0x684   : > { %v1911_v29 = vmul.f32 0.03125, %v1904_v32  ;;  %v1916_v34 = vmul.f32 %v1913_v31, %v1913_v31 }
 0x686   : > { %v1914_v37 = vsub.f32 %v1895_v21, %v1911_v29  ;;  %v1919_v40 = vsel %vm628_vm1, %v1916_v34, 0.0 }
 0x687   : > { %1920 = vadd.xlane.f32.xlu0 %v1919_v40 }
 0x688   : > { %v1908_v33 = vpop.xlane.xlu0 %1907  ;;  %v1917_v41 = vmul.f32 %v1914_v37, %v1914_v37 }
 0x689   : > { %v1912_v43 = vmul.f32 0.03125, %v1908_v33 }
 0x68a   : > { %v1922_v44 = vsel %vm628_vm1, %v1917_v41, 0.0 }
 0x68b   : > { %v1915_v45 = vsub.f32 %v1896_v27, %v1912_v43  ;;  %1923 = vadd.xlane.f32.xlu1 %v1922_v44 }
 0x68d   : > { %v1918_v46 = vmul.f32 %v1915_v45, %v1915_v45 }
 0x68f   : > { %v1925_v47 = vsel %vm1905_vm2, %v1918_v46, 0.0 }
 0x690   : > { %1926 = vadd.xlane.f32.xlu0 %v1925_v47 }
 0x714   : > { %v1921_v58 = vpop.xlane.xlu0 %1920 }
 0x715   : > { %v1928_v38 = vmul.f32 0.03125, %v1921_v58 }
 0x717   : > { %v1931_v61 = vadd.f32 1e-05, %v1928_v38 }
 0x718   : > { %v1924_v0 = vpop.xlane.xlu1 %1923 }
 0x719   : > { %3053 = vrsqrt.f32 %v1931_v61  ;;  %v1929_v57 = vmul.f32 0.03125, %v1924_v0 }
 0x71b   : > { %v1932_v62 = vadd.f32 1e-05, %v1929_v57 }
 0x71d   : > { %3055 = vrsqrt.f32 %v1932_v62  ;;  %v1927_v1 = vpop.xlane.xlu0 %1926 }
 0x71e   : > { %v1930_v5 = vmul.f32 0.03125, %v1927_v1 }
 0x720   : > { %v1933_v7 = vadd.f32 1e-05, %v1930_v5 }
 0x722   : > { %3057 = vrsqrt.f32 %v1933_v7 }
 0x723   : > { %v3054_v2 = vpop.eup %3053 }
 0x724   : > { %v1937_v8 = vmul.f32 %v3054_v2, %v1913_v31 }
 0x726   : > { %v1946_v10 = vmul.f32 %v2563_v3, %v1937_v8 }
 0x727   : > { %v3056_v12 = vpop.eup %3055 }
 0x728   : > { %v3657_v14 = vadd.f32 %v2564_v39, %v1946_v10  ;;  %v1938_v16 = vmul.f32 %v3056_v12, %v1914_v37 }
 0x72a   : > { %2830 = vmatmul.mubr.msk.f32.vlgmr.msra.gmra.mrb[30].mxu0 %vm628_vm1, %v3657_v14  ;;  %v1947_v17 = vmul.f32 %v2563_v3, %v1938_v16 }
 0x72b   : > { %2832 = vmatprep.mubr.msk.f32.mxu0 %vm3077_vm0, %v3078_v6  ;;  %2938 = vmatpush3.bf16.msra.mxu0 %v2937_v42 }
 0x72c   : > { %v3058_v19 = vpop.eup %3057  ;;  %v3663_v21 = vadd.f32 %v2564_v39, %v1947_v17  ;;  %2867 = vmatprep.subr.mxu0 %v3078_v6 }
 0x72d   : > { %v1939_v15 = vmul.f32 %v3058_v19, %v1915_v45 }
 0x72e   : > { %2833 = vmatmul.mubr.msk.f32.gmra.mrb[32].mxu0 %vm628_vm1, %v3663_v21 }
 0x72f   : > { %2835 = vmatprep.mubr.msk.f32.mxu0 %vm3077_vm0, %v3078_v6  ;;  %v1948_v24 = vmul.f32 %v2563_v3, %v1939_v15  ;;  %2868 = vmatpush3.msk.msra.mxu0 %vm881_vm6, %v2242_v22  ;;  %vm2076_vm6 = vcmask 523264  }
 0x731   : > { %v3671_v25 = vadd.f32 %v2564_v39, %v1948_v24 }
 0x733   : > { %2836 = vmatmul.mubr.msk.f32.gmra.mrb[34].mxu0 %vm628_vm1, %v3671_v25 }
 0x734   : > { %2869 = vmatprep.mubr.msk.f32.mxu0 %vm3077_vm0, %v3078_v6 }
 0x737   : > { %2870 = vmatmul.mubr.msk.f32.vlgmr.msra.gmra.mrb[36].mxu0 %vm823_vm4, %v3532_v4  ;;  %v2068_v4 = vld [vmem:[%s3752_s11 + $0x38] sm:$0xff] }
 0x738   : > { %2872 = vmatprep.mubr.msk.f32.mxu0 %vm3077_vm0, %v3078_v6  ;;  %v2934_v27 = vpack.c.bf16 %v2068_v4, %v2067_v26 }
 0x73a   : > { %2935 = vmatpush3.bf16.msra.mxu1 %v2934_v27 }
 0x73b   : > { %2873 = vmatmul.mubr.msk.f32.gmra.mrb[38].mxu0 %vm823_vm4, %v3543_v11  ;;  %v2565_v11 = vld [vmem:[%s3751_s10] ss:$0 sm:$0xff] }
 0x73c   : > { %2875 = vmatprep.mubr.msk.f32.mxu0 %vm3077_vm0, %v3078_v6 }
 0x73f   : > { %2876 = vmatmul.mubr.msk.f32.gmra.mrb[40].mxu0 %vm823_vm4, %v3549_v13 }
 0x7fd   : > { %v2044_v23 = vpop.f32.mrb[30].mxu0 }
 0x7fe   : > { %v2045_v28 = vadd.f32 %v2565_v11, %v2044_v23  ;;  %v2831_v30 = vpop.f32.mrb[31].mxu0 }
 0x800   : > { %v2058_v31 = vmax.f32 %v2045_v28, 0.0  ;;  %v2573_v28 = vld [vmem:[%s3754_s13] ss:$0 sm:$0xff] }
 0x801   : > { %v2049_v13 = vpop.f32.mrb[32].mxu0 }
 0x802   : > { %v2050_v32 = vadd.f32 %v2565_v11, %v2049_v13  ;;  %v2834_v29 = vpop.f32.mrb[33].mxu0  ;;  %2855 = vmatmul.mubr.msk.f32.vlgmr.msra.gmra.mrb[30].mxu1 %vm2076_vm6, %v2058_v31  ;;  %v2574_v31 = vld [vmem:[%s3755_s14] ss:$0 sm:$0xff] }
 0x803   : > { %2857 = vmatprep.mubr.msk.f32.mxu1 %vm3077_vm0, %v3078_v6 }
 0x804   : > { %v2059_v34 = vmax.f32 %v2050_v32, 0.0 }
 0x806   : > { %v2054_v37 = vpop.f32.mrb[34].mxu0  ;;  %2858 = vmatmul.mubr.msk.f32.gmra.mrb[32].mxu1 %vm2076_vm6, %v2059_v34 }
 0x807   : > { %v2055_v40 = vadd.f32 %v2565_v11, %v2054_v37  ;;  %v2837_v33 = vpop.f32.mrb[35].mxu0  ;;  %2860 = vmatprep.mubr.msk.f32.mxu1 %vm3077_vm0, %v3078_v6 }
 0x809   : > { %v2060_v41 = vmax.f32 %v2055_v40, 0.0 }
 0x80a   : > { %v2321_v43 = vpop.f32.mrb[36].mxu0 }
 0x80b   : > { %v2335_v44 = vadd.f32 %v2321_v43, %v2240_v9  ;;  %2861 = vmatmul.mubr.msk.f32.gmra.mrb[34].mxu1 %vm2076_vm6, %v2060_v41  ;;  %v2871_v45 = vpop.f32.mrb[37].mxu0 }
 0x80d   : > { %vm2338_vm11 = vcmp.ne.f32.partialorder %v2335_v44, 0.0 }
 0x80e   : > { %v2341_v46 = vsel %vm2338_vm11, 1.0, %v3078_v6  ;;  %v2326_v47 = vpop.f32.mrb[38].mxu0 }
 0x80f   : > { %2344 = vst.msk [vmem:[%s613_s0] sm:$0xff] %vm823_vm4, %v2341_v46  ;;  %v2336_v48 = vadd.f32 %v2326_v47, %v2241_v63  ;;  %v2874_v49 = vpop.f32.mrb[39].mxu0 }
 0x811   : > { %vm2339_vm12 = vcmp.ne.f32.partialorder %v2336_v48, 0.0 }
 0x812   : > { %v2342_v50 = vsel %vm2339_vm12, 1.0, %v3078_v6  ;;  %v2331_v35 = vpop.f32.mrb[40].mxu0 }
 0x813   : > { %2345 = vst.msk [vmem:[%s613_s0 + $0x8] sm:$0xff] %vm823_vm4, %v2342_v50  ;;  %v2337_v51 = vadd.f32 %v2331_v35, %v2242_v22  ;;  %v2877_v52 = vpop.f32.mrb[41].mxu0 }
 0x815   : > { %vm2340_vm0 = vcmp.ne.f32.partialorder %v2337_v51, 0.0 }
 0x816   : > { %v2343_v53 = vsel %vm2340_vm0, 1.0, %v3078_v6 }
 0x817   : > { %2346 = vst.msk [vmem:[%s613_s0 + $0x10] sm:$0x1] %vm830_vm5, %v2343_v53 }
 0x8d5   : > { %v2152_v18 = vpop.f32.mrb[30].mxu1 }
 0x8d6   : > { %v2153_v20 = vadd.f32 %v2569_v55, %v2152_v18  ;;  %v2856_v56 = vpop.f32.mrb[31].mxu1 }
 0x8d8   : > { %v2166_v54 = vadd.f32 %v2153_v20, %v3657_v14 }
 0x8d9   : > { %v2157_v59 = vpop.f32.mrb[32].mxu1 }
 0x8da   : > { %v2158_v36 = vadd.f32 %v2569_v55, %v2157_v59  ;;  %v2859_v60 = vpop.f32.mrb[33].mxu1  ;;  %v2171_v58 = vsel %vm628_vm1, %v2166_v54, 0.0 }
 0x8db   : > { %2172 = vadd.xlane.f32.xlu1 %v2171_v58 }
 0x8dc   : > { %v2167_v38 = vadd.f32 %v2158_v36, %v3663_v21 }
 0x8de   : > { %v2162_v6 = vpop.f32.mrb[34].mxu1  ;;  %v2174_v61 = vsel %vm628_vm1, %v2167_v38, 0.0 }
 0x8df   : > { %v2163_v0 = vadd.f32 %v2569_v55, %v2162_v6  ;;  %2175 = vadd.xlane.f32.xlu0 %v2174_v61  ;;  %v2862_v57 = vpop.f32.mrb[35].mxu1 }
 0x8e1   : > { %v2168_v62 = vadd.f32 %v2163_v0, %v3671_v25 }
 0x8e3   : > { %v2177_v1 = vsel %vm1905_vm2, %v2168_v62, 0.0 }
 0x8e4   : > { %2178 = vadd.xlane.f32.xlu1 %v2177_v1 }
 0x968   : > { %v2173_v5 = vpop.xlane.xlu1 %2172 }
 0x969   : > { %v2180_v7 = vmul.f32 0.03125, %v2173_v5 }
 0x96b   : > { %v2183_v2 = vsub.f32 %v2166_v54, %v2180_v7 }
 0x96c   : > { %v2176_v3 = vpop.xlane.xlu0 %2175 }
 0x96d   : > { %v2181_v8 = vmul.f32 0.03125, %v2176_v3  ;;  %v2186_v9 = vmul.f32 %v2183_v2, %v2183_v2 }
 0x96f   : > { %v2184_v63 = vsub.f32 %v2167_v38, %v2181_v8  ;;  %v2189_v39 = vsel %vm628_vm1, %v2186_v9, 0.0 }
 0x970   : > { %2190 = vadd.xlane.f32.xlu0 %v2189_v39 }
 0x971   : > { %v2179_v10 = vpop.xlane.xlu1 %2178  ;;  %v2187_v12 = vmul.f32 %v2184_v63, %v2184_v63 }
 0x972   : > { %v2182_v42 = vmul.f32 0.03125, %v2179_v10 }
 0x973   : > { %v2192_v14 = vsel %vm628_vm1, %v2187_v12, 0.0 }
 0x974   : > { %v2185_v16 = vsub.f32 %v2168_v62, %v2182_v42  ;;  %2193 = vadd.xlane.f32.xlu1 %v2192_v14 }
 0x976   : > { %v2188_v17 = vmul.f32 %v2185_v16, %v2185_v16 }
 0x978   : > { %v2195_v19 = vsel %vm1905_vm2, %v2188_v17, 0.0 }
 0x979   : > { %2196 = vadd.xlane.f32.xlu0 %v2195_v19 }
 0x9fd   : > { %v2191_v21 = vpop.xlane.xlu0 %2190 }
 0x9fe   : > { %v2198_v22 = vmul.f32 0.03125, %v2191_v21 }
 0xa00   : > { %v2201_v15 = vadd.f32 1e-05, %v2198_v22 }
 0xa01   : > { %v2194_v24 = vpop.xlane.xlu1 %2193 }
 0xa02   : > { %3059 = vrsqrt.f32 %v2201_v15  ;;  %v2199_v25 = vmul.f32 0.03125, %v2194_v24 }
 0xa04   : > { %v2202_v26 = vadd.f32 1e-05, %v2199_v25 }
 0xa06   : > { %3061 = vrsqrt.f32 %v2202_v26  ;;  %v2197_v4 = vpop.xlane.xlu0 %2196 }
 0xa07   : > { %v2200_v27 = vmul.f32 0.03125, %v2197_v4 }
 0xa09   : > { %v2203_v11 = vadd.f32 1e-05, %v2200_v27 }
 0xa0b   : > { %3063 = vrsqrt.f32 %v2203_v11 }
 0xa0c   : > { %v3060_v23 = vpop.eup %3059 }
 0xa0d   : > { %v2207_v30 = vmul.f32 %v3060_v23, %v2183_v2 }
 0xa0f   : > { %v2216_v13 = vmul.f32 %v2573_v28, %v2207_v30 }
 0xa10   : > { %v3062_v32 = vpop.eup %3061 }
 0xa11   : > { %v2225_v29 = vadd.f32 %v2574_v31, %v2216_v13  ;;  %v2208_v34 = vmul.f32 %v3062_v32, %v2184_v63 }
 0xa13   : > { %2228 = vst.msk [vmem:[%s603_s26] sm:$0xff] %vm628_vm1, %v2225_v29  ;;  %v2217_v37 = vmul.f32 %v2573_v28, %v2208_v34 }
 0xa15   : > { %v3064_v40 = vpop.eup %3063  ;;  %v2226_v33 = vadd.f32 %v2574_v31, %v2217_v37 }
 0xa16   : > { %v2209_v41 = vmul.f32 %v3064_v40, %v2185_v16 }
 0xa17   : > { %2229 = vst.msk [vmem:[%s603_s26 + $0x8] sm:$0xff] %vm628_vm1, %v2226_v33 }
 0xa18   : > { %v2218_v43 = vmul.f32 %v2573_v28, %v2209_v41 }
 0xa1a   : > { %v2227_v44 = vadd.f32 %v2574_v31, %v2218_v43 }
 0xa1c   : > { %2230 = vst.msk [vmem:[%s603_s26 + $0x10] sm:$0x1] %vm1905_vm2, %v2227_v44 }
 0xa1d PF: > { %s28_s24 = sadd.s32 1, %s3074_s24  }
 0xa1e   : > { %p25_p4 = scmp.ge.s32.totalorder %s28_s24, 4  }
 0xa20   :  { %27 = sbr.rel (!%p25_p4) target bundleno = 3 (0x3), region = 140 }

</bundles_post_ra>
